<compile_context>
chip_gen: v6e
topology: v6e:2x2x1
jax: 0.10.0
libtpu: 0.0.40
codegen_flags: <defaults>
</compile_context>

<pallas_src>
import math

import jax
import jax.numpy as jnp
import numpy as np
from jax.experimental import pallas as pl
from jax.experimental.pallas import tpu as pltpu  # noqa: F401  (TPU backend)

# ---------------- problem sizes (small, consistent with the module) -----------
S = 8          # sequence length
B = 2          # batch
E = 32         # embed_dim
HID = 64       # hidden_dim
H = 4          # num_heads
DH = E // H    # head dim
EPS = 1e-5     # nn.LayerNorm default eps


# --------------------------------- kernel ------------------------------------
def _attention_block_kernel(x_ref,                       # (S, B, E)
                            ln_w_ref, ln_b_ref,          # (1, E) each (shared LN)
                            wq_ref, wk_ref, wv_ref,      # (H, E, DH) each
                            bq_ref, bk_ref, bv_ref,      # (H, 1, DH) each
                            wo_ref, bo_ref,              # (H, DH, E), (1, E)
                            w1_ref, b1_ref,              # (E, HID), (1, HID)
                            w2_ref, b2_ref,              # (HID, E), (1, E)
                            o_ref):                      # (S, B, E)
    x3 = x_ref[...]                                      # (S, B, E) f32
    ln_w = ln_w_ref[...]
    ln_b = ln_b_ref[...]
    wq, wk, wv = wq_ref[...], wk_ref[...], wv_ref[...]
    bq, bk, bv = bq_ref[...], bk_ref[...], bv_ref[...]
    wo, bo = wo_ref[...], bo_ref[...]
    w1, b1 = w1_ref[...], b1_ref[...]
    w2, b2 = w2_ref[...], b2_ref[...]

    scale = 1.0 / math.sqrt(DH)
    inv_sqrt2 = 1.0 / math.sqrt(2.0)
    # One iota, reused for both the per-batch extraction and the output merge.
    batch_idx = jax.lax.broadcasted_iota(jnp.int32, (S, B, E), 1)

    def layernorm(h):                       # h: (S, E); shared affine params
        mu = jnp.mean(h, axis=-1, keepdims=True)
        c = h - mu
        var = jnp.mean(c * c, axis=-1, keepdims=True)
        return c * jax.lax.rsqrt(var + EPS) * ln_w + ln_b

    out_acc = jnp.zeros((S, B, E), jnp.float32)

    for b in range(B):                      # static unroll over the tiny batch
        # ---- pull batch column b out of the (S, B, E) slab (VPU/XLU only) ---
        xb = jnp.sum(jnp.where(batch_idx == b, x3, 0.0), axis=1)       # (S, E)

        # ---- pre-LN + multi-head self-attention ------------------------------
        h = layernorm(xb)                                              # (S, E)
        hh = jnp.broadcast_to(h, (H, S, E))                            # (H, S, E)
        q = jnp.einsum('hse,hed->hsd', hh, wq,
                       preferred_element_type=jnp.float32) + bq        # (H, S, DH)
        k = jnp.einsum('hse,hed->hsd', hh, wk,
                       preferred_element_type=jnp.float32) + bk
        v = jnp.einsum('hse,hed->hsd', hh, wv,
                       preferred_element_type=jnp.float32) + bv

        s = jnp.einsum('hqd,hkd->hqk', q, k,
                       preferred_element_type=jnp.float32) * scale     # (H, S, S)
        s = s - jnp.max(s, axis=-1, keepdims=True)
        p = jnp.exp(s)
        p = p * pl.reciprocal(jnp.sum(p, axis=-1, keepdims=True), approx=True)
        ctx = jnp.einsum('hqk,hkd->hqd', p, v,
                         preferred_element_type=jnp.float32)           # (H, S, DH)
        # per-head output projection; head "concat" becomes a leading-axis sum
        attn = jnp.sum(jnp.einsum('hqd,hde->hqe', ctx, wo,
                                  preferred_element_type=jnp.float32),
                       axis=0) + bo                                     # (S, E)

        # ---- residual, second (shared) LN, GELU MLP, residual ----------------
        x1 = xb + attn
        x2 = layernorm(x1)
        g = jnp.dot(x2, w1, preferred_element_type=jnp.float32) + b1   # (S, HID)
        g = 0.5 * g * (1.0 + jax.lax.erf(g * inv_sqrt2))                # exact GELU
        m = jnp.dot(g, w2, preferred_element_type=jnp.float32) + b2    # (S, E)
        yb = x2 + m                                                     # (S, E)

        # ---- merge batch column b back into the (S, B, E) output slab -------
        out_acc = jnp.where(batch_idx == b, yb[:, None, :], out_acc)

    # Single full-tile store; output already in PyTorch (S, B, E) layout, so the
    # wrapper needs NO transpose (the kernel is the only XLA op on the hot path).
    o_ref[...] = out_acc.astype(o_ref.dtype)


# ---------------------- host-side (one-time) weight prep ----------------------
def prepare_params(params):
    """Transpose / per-head-split the PyTorch-layout weights once, outside jit.

    No `.T` or head reshapes remain inside the kernel or on the hot path.
    """
    ln_w, ln_b, in_w, in_b, out_w, out_b, w1, b1, w2, b2 = params

    def per_head_w(w):                     # w: (E, E), rows = h*DH+d, cols = e
        return jnp.transpose(w.T.reshape(E, H, DH), (1, 0, 2))   # (H, E, DH)

    wq = per_head_w(in_w[0 * E:1 * E])
    wk = per_head_w(in_w[1 * E:2 * E])
    wv = per_head_w(in_w[2 * E:3 * E])
    bq = in_b[0 * E:1 * E].reshape(H, 1, DH)
    bk = in_b[1 * E:2 * E].reshape(H, 1, DH)
    bv = in_b[2 * E:3 * E].reshape(H, 1, DH)
    wo = out_w.T.reshape(H, DH, E)         # wo[h, d, e'] = out_w[e', h*DH+d]

    return (ln_w.reshape(1, E), ln_b.reshape(1, E),
            wq, wk, wv, bq, bk, bv,
            wo, out_b.reshape(1, E),
            w1.T, b1.reshape(1, HID),
            w2.T, b2.reshape(1, E))


# -------------------------------- wrapper -------------------------------------
@jax.jit
def attention_block(x_sbe, kparams):
    """x_sbe: (S, B, E) float32 (PyTorch MHA layout). Returns (S, B, E).

    Single grid-less pallas_call; every operand is a full array in VMEM (a few
    KB each, far under any VMEM limit on v5e/v6e/v7x).  Input and output are
    both in the PyTorch (S, B, E) layout, so no wrapper-side transposes remain.
    """
    return pl.pallas_call(
        _attention_block_kernel,
        out_shape=jax.ShapeDtypeStruct((S, B, E), jnp.float32),
    )(x_sbe, *kparams)


# --------------------------- pure-JAX reference --------------------------------
def attention_block_ref(x, params):
    """Mirrors the PyTorch module exactly (f32, exact softmax/erf)."""
    ln_w, ln_b, in_w, in_b, out_w, out_b, w1, b1, w2, b2 = params

    def layernorm(h):
        mu = h.mean(-1, keepdims=True)
        var = ((h - mu) ** 2).mean(-1, keepdims=True)
        return (h - mu) / jnp.sqrt(var + EPS) * ln_w + ln_b

    h = layernorm(x)                                            # (S, B, E)
    qkv = jnp.einsum('sbe,fe->sbf', h, in_w) + in_b              # (S, B, 3E)
    q, k, v = qkv[..., :E], qkv[..., E:2 * E], qkv[..., 2 * E:]
    q = q.reshape(S, B, H, DH) * (1.0 / math.sqrt(DH))
    k = k.reshape(S, B, H, DH)
    v = v.reshape(S, B, H, DH)
    s = jnp.einsum('qbhd,kbhd->bhqk', q, k)
    p = jax.nn.softmax(s, axis=-1)
    a = jnp.einsum('bhqk,kbhd->qbhd', p, v).reshape(S, B, E)
    a = jnp.einsum('sbe,fe->sbf', a, out_w) + out_b
    x1 = x + a
    x2 = layernorm(x1)
    hh = jnp.einsum('sbe,fe->sbf', x2, w1) + b1
    g = 0.5 * hh * (1.0 + jax.lax.erf(hh / math.sqrt(2.0)))
    return x2 + jnp.einsum('sbf,ef->sbe', g, w2) + b2


# --------------------------------- main ----------------------------------------
if __name__ == "__main__":
    ks = jax.random.split(jax.random.PRNGKey(0), 11)

    # Deterministic synthetic parameters (shapes follow the nn.Module __init__).
    # Non-trivial LayerNorm affine params so the shared-LN path is exercised.
    ln_w = 1.0 + 0.1 * jax.random.normal(ks[0], (E,), jnp.float32)
    ln_b = 0.1 * jax.random.normal(ks[1], (E,), jnp.float32)
    in_w = 0.05 * jax.random.normal(ks[2], (3 * E, E), jnp.float32)
    in_b = 0.05 * jax.random.normal(ks[3], (3 * E,), jnp.float32)
    out_w = 0.05 * jax.random.normal(ks[4], (E, E), jnp.float32)
    out_b = 0.05 * jax.random.normal(ks[5], (E,), jnp.float32)
    w1 = 0.05 * jax.random.normal(ks[6], (HID, E), jnp.float32)
    b1 = 0.05 * jax.random.normal(ks[7], (HID,), jnp.float32)
    w2 = 0.05 * jax.random.normal(ks[8], (E, HID), jnp.float32)
    b2 = 0.05 * jax.random.normal(ks[9], (E,), jnp.float32)
    params = (ln_w, ln_b, in_w, in_b, out_w, out_b, w1, b1, w2, b2)

    kparams = prepare_params(params)                       # one-time weight prep
    x = jax.random.normal(ks[10], (S, B, E), jnp.float32)  # PyTorch (L, N, E)

    out = jax.block_until_ready(attention_block(x, kparams))
    ref = attention_block_ref(x, params)

    # Tolerance covers the EUP approximate reciprocal used for the softmax
    # denominator; everything else is f32-exact.
    np.testing.assert_allclose(np.asarray(out), np.asarray(ref),
                               rtol=1e-3, atol=1e-3)
    print("KERNEL_OK")
</pallas_src>

<mosaic_0001>
module attributes {stable_mosaic.version = 11 : i64} {
  func.func @_attention_block_kernel(%arg0: memref<8x2x32xf32, #tpu.memory_space<vmem>>, %arg1: memref<1x32xf32, #tpu.memory_space<vmem>>, %arg2: memref<1x32xf32, #tpu.memory_space<vmem>>, %arg3: memref<4x32x8xf32, #tpu.memory_space<vmem>>, %arg4: memref<4x32x8xf32, #tpu.memory_space<vmem>>, %arg5: memref<4x32x8xf32, #tpu.memory_space<vmem>>, %arg6: memref<4x1x8xf32, #tpu.memory_space<vmem>>, %arg7: memref<4x1x8xf32, #tpu.memory_space<vmem>>, %arg8: memref<4x1x8xf32, #tpu.memory_space<vmem>>, %arg9: memref<4x8x32xf32, #tpu.memory_space<vmem>>, %arg10: memref<1x32xf32, #tpu.memory_space<vmem>>, %arg11: memref<32x64xf32, #tpu.memory_space<vmem>>, %arg12: memref<1x64xf32, #tpu.memory_space<vmem>>, %arg13: memref<64x32xf32, #tpu.memory_space<vmem>>, %arg14: memref<1x32xf32, #tpu.memory_space<vmem>>, %arg15: memref<8x2x32xf32, #tpu.memory_space<vmem>>) attributes {dimension_semantics = [], scalar_prefetch = 0 : i64, scratch_operands = 0 : i64, tpu.core_type = #tpu.core_type<tc>} {
    %c0 = arith.constant 0 : index
    %c0_0 = arith.constant 0 : index
    %c0_1 = arith.constant 0 : index
    %0 = vector.load %arg0[%c0, %c0_0, %c0_1] : memref<8x2x32xf32, #tpu.memory_space<vmem>>, vector<8x2x32xf32>
    %c0_2 = arith.constant 0 : index
    %c0_3 = arith.constant 0 : index
    %1 = vector.load %arg1[%c0_2, %c0_3] : memref<1x32xf32, #tpu.memory_space<vmem>>, vector<1x32xf32>
    %c0_4 = arith.constant 0 : index
    %c0_5 = arith.constant 0 : index
    %2 = vector.load %arg2[%c0_4, %c0_5] : memref<1x32xf32, #tpu.memory_space<vmem>>, vector<1x32xf32>
    %c0_6 = arith.constant 0 : index
    %c0_7 = arith.constant 0 : index
    %c0_8 = arith.constant 0 : index
    %3 = vector.load %arg3[%c0_6, %c0_7, %c0_8] : memref<4x32x8xf32, #tpu.memory_space<vmem>>, vector<4x32x8xf32>
    %c0_9 = arith.constant 0 : index
    %c0_10 = arith.constant 0 : index
    %c0_11 = arith.constant 0 : index
    %4 = vector.load %arg4[%c0_9, %c0_10, %c0_11] : memref<4x32x8xf32, #tpu.memory_space<vmem>>, vector<4x32x8xf32>
    %c0_12 = arith.constant 0 : index
    %c0_13 = arith.constant 0 : index
    %c0_14 = arith.constant 0 : index
    %5 = vector.load %arg5[%c0_12, %c0_13, %c0_14] : memref<4x32x8xf32, #tpu.memory_space<vmem>>, vector<4x32x8xf32>
    %c0_15 = arith.constant 0 : index
    %c0_16 = arith.constant 0 : index
    %c0_17 = arith.constant 0 : index
    %6 = vector.load %arg6[%c0_15, %c0_16, %c0_17] : memref<4x1x8xf32, #tpu.memory_space<vmem>>, vector<4x1x8xf32>
    %c0_18 = arith.constant 0 : index
    %c0_19 = arith.constant 0 : index
    %c0_20 = arith.constant 0 : index
    %7 = vector.load %arg7[%c0_18, %c0_19, %c0_20] : memref<4x1x8xf32, #tpu.memory_space<vmem>>, vector<4x1x8xf32>
    %c0_21 = arith.constant 0 : index
    %c0_22 = arith.constant 0 : index
    %c0_23 = arith.constant 0 : index
    %8 = vector.load %arg8[%c0_21, %c0_22, %c0_23] : memref<4x1x8xf32, #tpu.memory_space<vmem>>, vector<4x1x8xf32>
    %c0_24 = arith.constant 0 : index
    %c0_25 = arith.constant 0 : index
    %c0_26 = arith.constant 0 : index
    %9 = vector.load %arg9[%c0_24, %c0_25, %c0_26] : memref<4x8x32xf32, #tpu.memory_space<vmem>>, vector<4x8x32xf32>
    %c0_27 = arith.constant 0 : index
    %c0_28 = arith.constant 0 : index
    %10 = vector.load %arg10[%c0_27, %c0_28] : memref<1x32xf32, #tpu.memory_space<vmem>>, vector<1x32xf32>
    %c0_29 = arith.constant 0 : index
    %c0_30 = arith.constant 0 : index
    %11 = vector.load %arg11[%c0_29, %c0_30] : memref<32x64xf32, #tpu.memory_space<vmem>>, vector<32x64xf32>
    %c0_31 = arith.constant 0 : index
    %c0_32 = arith.constant 0 : index
    %12 = vector.load %arg12[%c0_31, %c0_32] : memref<1x64xf32, #tpu.memory_space<vmem>>, vector<1x64xf32>
    %c0_33 = arith.constant 0 : index
    %c0_34 = arith.constant 0 : index
    %13 = vector.load %arg13[%c0_33, %c0_34] : memref<64x32xf32, #tpu.memory_space<vmem>>, vector<64x32xf32>
    %c0_35 = arith.constant 0 : index
    %c0_36 = arith.constant 0 : index
    %14 = vector.load %arg14[%c0_35, %c0_36] : memref<1x32xf32, #tpu.memory_space<vmem>>, vector<1x32xf32>
    %15 = tpu.iota {dimensions = array<i32: 1>} : vector<8x2x32xi32>
    %cst = arith.constant 0.000000e+00 : f32
    %16 = vector.broadcast %cst : f32 to vector<8x2x32xf32>
    %c0_i32 = arith.constant 0 : i32
    %17 = vector.broadcast %c0_i32 : i32 to vector<8x2x32xi32>
    %18 = arith.cmpi eq, %15, %17 : vector<8x2x32xi32>
    %cst_37 = arith.constant 0.000000e+00 : f32
    %19 = vector.broadcast %cst_37 : f32 to vector<8x2x32xf32>
    %20 = arith.select %18, %0, %19 : vector<8x2x32xi1>, vector<8x2x32xf32>
    %cst_38 = arith.constant dense<0.000000e+00> : vector<8x32xf32>
    %21 = vector.multi_reduction <add>, %20, %cst_38 [1] : vector<8x2x32xf32> to vector<8x32xf32>
    %cst_39 = arith.constant dense<0.000000e+00> : vector<8xf32>
    %22 = vector.multi_reduction <add>, %21, %cst_39 [1] : vector<8x32xf32> to vector<8xf32>
    %23 = vector.shape_cast %22 : vector<8xf32> to vector<8x1xf32>
    %cst_40 = arith.constant 3.200000e+01 : f32
    %24 = vector.broadcast %cst_40 : f32 to vector<8x1xf32>
    %25 = arith.divf %23, %24 : vector<8x1xf32>
    %26 = vector.broadcast %25 : vector<8x1xf32> to vector<8x32xf32>
    %27 = arith.subf %21, %26 : vector<8x32xf32>
    %28 = arith.mulf %27, %27 : vector<8x32xf32>
    %cst_41 = arith.constant dense<0.000000e+00> : vector<8xf32>
    %29 = vector.multi_reduction <add>, %28, %cst_41 [1] : vector<8x32xf32> to vector<8xf32>
    %30 = vector.shape_cast %29 : vector<8xf32> to vector<8x1xf32>
    %cst_42 = arith.constant 3.200000e+01 : f32
    %31 = vector.broadcast %cst_42 : f32 to vector<8x1xf32>
    %32 = arith.divf %30, %31 : vector<8x1xf32>
    %cst_43 = arith.constant 9.99999974E-6 : f32
    %33 = vector.broadcast %cst_43 : f32 to vector<8x1xf32>
    %34 = arith.addf %32, %33 : vector<8x1xf32>
    %35 = math.rsqrt %34 : vector<8x1xf32>
    %36 = vector.broadcast %35 : vector<8x1xf32> to vector<8x32xf32>
    %37 = arith.mulf %27, %36 : vector<8x32xf32>
    %38 = vector.broadcast %1 : vector<1x32xf32> to vector<8x32xf32>
    %39 = arith.mulf %37, %38 : vector<8x32xf32>
    %40 = vector.broadcast %2 : vector<1x32xf32> to vector<8x32xf32>
    %41 = arith.addf %39, %40 : vector<8x32xf32>
    %42 = vector.shape_cast %41 : vector<8x32xf32> to vector<1x8x32xf32>
    %43 = vector.broadcast %42 : vector<1x8x32xf32> to vector<4x8x32xf32>
    "tpu.trace_start"() <{level = 10 : i32, message = "hse,hed->hsd"}> : () -> ()
    %cst_44 = arith.constant dense<0.000000e+00> : vector<4x8x8xf32>
    %44 = tpu.matmul %43, %3, %cst_44 {dimension_numbers = #tpu.dot_dimension_numbers<[2], [1], [1], [2], [0, 0, 0, 1, 1, 2], [0], [0]>} : vector<4x8x32xf32>, vector<4x32x8xf32>, vector<4x8x8xf32> -> vector<4x8x8xf32>
    "tpu.trace_stop"() : () -> ()
    %45 = vector.broadcast %6 : vector<4x1x8xf32> to vector<4x8x8xf32>
    %46 = arith.addf %44, %45 : vector<4x8x8xf32>
    "tpu.trace_start"() <{level = 10 : i32, message = "hse,hed->hsd"}> : () -> ()
    %cst_45 = arith.constant dense<0.000000e+00> : vector<4x8x8xf32>
    %47 = tpu.matmul %43, %4, %cst_45 {dimension_numbers = #tpu.dot_dimension_numbers<[2], [1], [1], [2], [0, 0, 0, 1, 1, 2], [0], [0]>} : vector<4x8x32xf32>, vector<4x32x8xf32>, vector<4x8x8xf32> -> vector<4x8x8xf32>
    "tpu.trace_stop"() : () -> ()
    %48 = vector.broadcast %7 : vector<4x1x8xf32> to vector<4x8x8xf32>
    %49 = arith.addf %47, %48 : vector<4x8x8xf32>
    "tpu.trace_start"() <{level = 10 : i32, message = "hse,hed->hsd"}> : () -> ()
    %cst_46 = arith.constant dense<0.000000e+00> : vector<4x8x8xf32>
    %50 = tpu.matmul %43, %5, %cst_46 {dimension_numbers = #tpu.dot_dimension_numbers<[2], [1], [1], [2], [0, 0, 0, 1, 1, 2], [0], [0]>} : vector<4x8x32xf32>, vector<4x32x8xf32>, vector<4x8x8xf32> -> vector<4x8x8xf32>
    "tpu.trace_stop"() : () -> ()
    %51 = vector.broadcast %8 : vector<4x1x8xf32> to vector<4x8x8xf32>
    %52 = arith.addf %50, %51 : vector<4x8x8xf32>
    "tpu.trace_start"() <{level = 10 : i32, message = "hqd,hkd->hqk"}> : () -> ()
    %cst_47 = arith.constant dense<0.000000e+00> : vector<4x8x8xf32>
    %53 = tpu.matmul %46, %49, %cst_47 {dimension_numbers = #tpu.dot_dimension_numbers<[2], [2], [1], [1], [0, 0, 0, 1, 1, 1], [0], [0]>} : vector<4x8x8xf32>, vector<4x8x8xf32>, vector<4x8x8xf32> -> vector<4x8x8xf32>
    "tpu.trace_stop"() : () -> ()
    %cst_48 = arith.constant 0.353553385 : f32
    %54 = vector.broadcast %cst_48 : f32 to vector<4x8x8xf32>
    %55 = arith.mulf %53, %54 : vector<4x8x8xf32>
    %cst_49 = arith.constant dense<0xFF800000> : vector<4x8xf32>
    %56 = vector.multi_reduction <maximumf>, %55, %cst_49 [2] : vector<4x8x8xf32> to vector<4x8xf32>
    %57 = vector.shape_cast %56 : vector<4x8xf32> to vector<4x8x1xf32>
    %58 = vector.broadcast %57 : vector<4x8x1xf32> to vector<4x8x8xf32>
    %59 = arith.subf %55, %58 : vector<4x8x8xf32>
    %60 = math.exp %59 : vector<4x8x8xf32>
    %cst_50 = arith.constant dense<0.000000e+00> : vector<4x8xf32>
    %61 = vector.multi_reduction <add>, %60, %cst_50 [2] : vector<4x8x8xf32> to vector<4x8xf32>
    %62 = vector.shape_cast %61 : vector<4x8xf32> to vector<4x8x1xf32>
    %63 = tpu.reciprocal %62 {approx = true} : vector<4x8x1xf32> -> vector<4x8x1xf32>
    %64 = vector.broadcast %63 : vector<4x8x1xf32> to vector<4x8x8xf32>
    %65 = arith.mulf %60, %64 : vector<4x8x8xf32>
    "tpu.trace_start"() <{level = 10 : i32, message = "hqk,hkd->hqd"}> : () -> ()
    %cst_51 = arith.constant dense<0.000000e+00> : vector<4x8x8xf32>
    %66 = tpu.matmul %65, %52, %cst_51 {dimension_numbers = #tpu.dot_dimension_numbers<[2], [1], [1], [2], [0, 0, 0, 1, 1, 2], [0], [0]>} : vector<4x8x8xf32>, vector<4x8x8xf32>, vector<4x8x8xf32> -> vector<4x8x8xf32>
    "tpu.trace_stop"() : () -> ()
    "tpu.trace_start"() <{level = 10 : i32, message = "hqd,hde->hqe"}> : () -> ()
    %cst_52 = arith.constant dense<0.000000e+00> : vector<4x8x32xf32>
    %67 = tpu.matmul %66, %9, %cst_52 {dimension_numbers = #tpu.dot_dimension_numbers<[2], [1], [1], [2], [0, 0, 0, 1, 1, 2], [0], [0]>} : vector<4x8x8xf32>, vector<4x8x32xf32>, vector<4x8x32xf32> -> vector<4x8x32xf32>
    "tpu.trace_stop"() : () -> ()
    %cst_53 = arith.constant dense<0.000000e+00> : vector<8x32xf32>
    %68 = vector.multi_reduction <add>, %67, %cst_53 [0] : vector<4x8x32xf32> to vector<8x32xf32>
    %69 = vector.broadcast %10 : vector<1x32xf32> to vector<8x32xf32>
    %70 = arith.addf %68, %69 : vector<8x32xf32>
    %71 = arith.addf %21, %70 : vector<8x32xf32>
    %cst_54 = arith.constant dense<0.000000e+00> : vector<8xf32>
    %72 = vector.multi_reduction <add>, %71, %cst_54 [1] : vector<8x32xf32> to vector<8xf32>
    %73 = vector.shape_cast %72 : vector<8xf32> to vector<8x1xf32>
    %cst_55 = arith.constant 3.200000e+01 : f32
    %74 = vector.broadcast %cst_55 : f32 to vector<8x1xf32>
    %75 = arith.divf %73, %74 : vector<8x1xf32>
    %76 = vector.broadcast %75 : vector<8x1xf32> to vector<8x32xf32>
    %77 = arith.subf %71, %76 : vector<8x32xf32>
    %78 = arith.mulf %77, %77 : vector<8x32xf32>
    %cst_56 = arith.constant dense<0.000000e+00> : vector<8xf32>
    %79 = vector.multi_reduction <add>, %78, %cst_56 [1] : vector<8x32xf32> to vector<8xf32>
    %80 = vector.shape_cast %79 : vector<8xf32> to vector<8x1xf32>
    %cst_57 = arith.constant 3.200000e+01 : f32
    %81 = vector.broadcast %cst_57 : f32 to vector<8x1xf32>
    %82 = arith.divf %80, %81 : vector<8x1xf32>
    %cst_58 = arith.constant 9.99999974E-6 : f32
    %83 = vector.broadcast %cst_58 : f32 to vector<8x1xf32>
    %84 = arith.addf %82, %83 : vector<8x1xf32>
    %85 = math.rsqrt %84 : vector<8x1xf32>
    %86 = vector.broadcast %85 : vector<8x1xf32> to vector<8x32xf32>
    %87 = arith.mulf %77, %86 : vector<8x32xf32>
    %88 = vector.broadcast %1 : vector<1x32xf32> to vector<8x32xf32>
    %89 = arith.mulf %87, %88 : vector<8x32xf32>
    %90 = vector.broadcast %2 : vector<1x32xf32> to vector<8x32xf32>
    %91 = arith.addf %89, %90 : vector<8x32xf32>
    %cst_59 = arith.constant dense<0.000000e+00> : vector<8x64xf32>
    %92 = tpu.matmul %91, %11, %cst_59 {dimension_numbers = #tpu.dot_dimension_numbers<[1], [0], [0], [1], [0, 0, 1, 1], [], []>} : vector<8x32xf32>, vector<32x64xf32>, vector<8x64xf32> -> vector<8x64xf32>
    %93 = vector.broadcast %12 : vector<1x64xf32> to vector<8x64xf32>
    %94 = arith.addf %92, %93 : vector<8x64xf32>
    %cst_60 = arith.constant 5.000000e-01 : f32
    %95 = vector.broadcast %cst_60 : f32 to vector<8x64xf32>
    %96 = arith.mulf %95, %94 : vector<8x64xf32>
    %cst_61 = arith.constant 0.707106769 : f32
    %97 = vector.broadcast %cst_61 : f32 to vector<8x64xf32>
    %98 = arith.mulf %94, %97 : vector<8x64xf32>
    %99 = math.erf %98 : vector<8x64xf32>
    %cst_62 = arith.constant 1.000000e+00 : f32
    %100 = vector.broadcast %cst_62 : f32 to vector<8x64xf32>
    %101 = arith.addf %100, %99 : vector<8x64xf32>
    %102 = arith.mulf %96, %101 : vector<8x64xf32>
    %cst_63 = arith.constant dense<0.000000e+00> : vector<8x32xf32>
    %103 = tpu.matmul %102, %13, %cst_63 {dimension_numbers = #tpu.dot_dimension_numbers<[1], [0], [0], [1], [0, 0, 1, 1], [], []>} : vector<8x64xf32>, vector<64x32xf32>, vector<8x32xf32> -> vector<8x32xf32>
    %104 = vector.broadcast %14 : vector<1x32xf32> to vector<8x32xf32>
    %105 = arith.addf %103, %104 : vector<8x32xf32>
    %106 = arith.addf %91, %105 : vector<8x32xf32>
    %c0_i32_64 = arith.constant 0 : i32
    %107 = vector.broadcast %c0_i32_64 : i32 to vector<8x2x32xi32>
    %108 = arith.cmpi eq, %15, %107 : vector<8x2x32xi32>
    %109 = vector.shape_cast %106 : vector<8x32xf32> to vector<8x1x32xf32>
    %110 = vector.shape_cast %109 : vector<8x1x32xf32> to vector<8x1x32xf32>
    %111 = vector.broadcast %110 : vector<8x1x32xf32> to vector<8x2x32xf32>
    %112 = arith.select %108, %111, %16 : vector<8x2x32xi1>, vector<8x2x32xf32>
    %c1_i32 = arith.constant 1 : i32
    %113 = vector.broadcast %c1_i32 : i32 to vector<8x2x32xi32>
    %114 = arith.cmpi eq, %15, %113 : vector<8x2x32xi32>
    %cst_65 = arith.constant 0.000000e+00 : f32
    %115 = vector.broadcast %cst_65 : f32 to vector<8x2x32xf32>
    %116 = arith.select %114, %0, %115 : vector<8x2x32xi1>, vector<8x2x32xf32>
    %cst_66 = arith.constant dense<0.000000e+00> : vector<8x32xf32>
    %117 = vector.multi_reduction <add>, %116, %cst_66 [1] : vector<8x2x32xf32> to vector<8x32xf32>
    %cst_67 = arith.constant dense<0.000000e+00> : vector<8xf32>
    %118 = vector.multi_reduction <add>, %117, %cst_67 [1] : vector<8x32xf32> to vector<8xf32>
    %119 = vector.shape_cast %118 : vector<8xf32> to vector<8x1xf32>
    %cst_68 = arith.constant 3.200000e+01 : f32
    %120 = vector.broadcast %cst_68 : f32 to vector<8x1xf32>
    %121 = arith.divf %119, %120 : vector<8x1xf32>
    %122 = vector.broadcast %121 : vector<8x1xf32> to vector<8x32xf32>
    %123 = arith.subf %117, %122 : vector<8x32xf32>
    %124 = arith.mulf %123, %123 : vector<8x32xf32>
    %cst_69 = arith.constant dense<0.000000e+00> : vector<8xf32>
    %125 = vector.multi_reduction <add>, %124, %cst_69 [1] : vector<8x32xf32> to vector<8xf32>
    %126 = vector.shape_cast %125 : vector<8xf32> to vector<8x1xf32>
    %cst_70 = arith.constant 3.200000e+01 : f32
    %127 = vector.broadcast %cst_70 : f32 to vector<8x1xf32>
    %128 = arith.divf %126, %127 : vector<8x1xf32>
    %cst_71 = arith.constant 9.99999974E-6 : f32
    %129 = vector.broadcast %cst_71 : f32 to vector<8x1xf32>
    %130 = arith.addf %128, %129 : vector<8x1xf32>
    %131 = math.rsqrt %130 : vector<8x1xf32>
    %132 = vector.broadcast %131 : vector<8x1xf32> to vector<8x32xf32>
    %133 = arith.mulf %123, %132 : vector<8x32xf32>
    %134 = vector.broadcast %1 : vector<1x32xf32> to vector<8x32xf32>
    %135 = arith.mulf %133, %134 : vector<8x32xf32>
    %136 = vector.broadcast %2 : vector<1x32xf32> to vector<8x32xf32>
    %137 = arith.addf %135, %136 : vector<8x32xf32>
    %138 = vector.shape_cast %137 : vector<8x32xf32> to vector<1x8x32xf32>
    %139 = vector.broadcast %138 : vector<1x8x32xf32> to vector<4x8x32xf32>
    "tpu.trace_start"() <{level = 10 : i32, message = "hse,hed->hsd"}> : () -> ()
    %cst_72 = arith.constant dense<0.000000e+00> : vector<4x8x8xf32>
    %140 = tpu.matmul %139, %3, %cst_72 {dimension_numbers = #tpu.dot_dimension_numbers<[2], [1], [1], [2], [0, 0, 0, 1, 1, 2], [0], [0]>} : vector<4x8x32xf32>, vector<4x32x8xf32>, vector<4x8x8xf32> -> vector<4x8x8xf32>
    "tpu.trace_stop"() : () -> ()
    %141 = vector.broadcast %6 : vector<4x1x8xf32> to vector<4x8x8xf32>
    %142 = arith.addf %140, %141 : vector<4x8x8xf32>
    "tpu.trace_start"() <{level = 10 : i32, message = "hse,hed->hsd"}> : () -> ()
    %cst_73 = arith.constant dense<0.000000e+00> : vector<4x8x8xf32>
    %143 = tpu.matmul %139, %4, %cst_73 {dimension_numbers = #tpu.dot_dimension_numbers<[2], [1], [1], [2], [0, 0, 0, 1, 1, 2], [0], [0]>} : vector<4x8x32xf32>, vector<4x32x8xf32>, vector<4x8x8xf32> -> vector<4x8x8xf32>
    "tpu.trace_stop"() : () -> ()
    %144 = vector.broadcast %7 : vector<4x1x8xf32> to vector<4x8x8xf32>
    %145 = arith.addf %143, %144 : vector<4x8x8xf32>
    "tpu.trace_start"() <{level = 10 : i32, message = "hse,hed->hsd"}> : () -> ()
    %cst_74 = arith.constant dense<0.000000e+00> : vector<4x8x8xf32>
    %146 = tpu.matmul %139, %5, %cst_74 {dimension_numbers = #tpu.dot_dimension_numbers<[2], [1], [1], [2], [0, 0, 0, 1, 1, 2], [0], [0]>} : vector<4x8x32xf32>, vector<4x32x8xf32>, vector<4x8x8xf32> -> vector<4x8x8xf32>
    "tpu.trace_stop"() : () -> ()
    %147 = vector.broadcast %8 : vector<4x1x8xf32> to vector<4x8x8xf32>
    %148 = arith.addf %146, %147 : vector<4x8x8xf32>
    "tpu.trace_start"() <{level = 10 : i32, message = "hqd,hkd->hqk"}> : () -> ()
    %cst_75 = arith.constant dense<0.000000e+00> : vector<4x8x8xf32>
    %149 = tpu.matmul %142, %145, %cst_75 {dimension_numbers = #tpu.dot_dimension_numbers<[2], [2], [1], [1], [0, 0, 0, 1, 1, 1], [0], [0]>} : vector<4x8x8xf32>, vector<4x8x8xf32>, vector<4x8x8xf32> -> vector<4x8x8xf32>
    "tpu.trace_stop"() : () -> ()
    %cst_76 = arith.constant 0.353553385 : f32
    %150 = vector.broadcast %cst_76 : f32 to vector<4x8x8xf32>
    %151 = arith.mulf %149, %150 : vector<4x8x8xf32>
    %cst_77 = arith.constant dense<0xFF800000> : vector<4x8xf32>
    %152 = vector.multi_reduction <maximumf>, %151, %cst_77 [2] : vector<4x8x8xf32> to vector<4x8xf32>
    %153 = vector.shape_cast %152 : vector<4x8xf32> to vector<4x8x1xf32>
    %154 = vector.broadcast %153 : vector<4x8x1xf32> to vector<4x8x8xf32>
    %155 = arith.subf %151, %154 : vector<4x8x8xf32>
    %156 = math.exp %155 : vector<4x8x8xf32>
    %cst_78 = arith.constant dense<0.000000e+00> : vector<4x8xf32>
    %157 = vector.multi_reduction <add>, %156, %cst_78 [2] : vector<4x8x8xf32> to vector<4x8xf32>
    %158 = vector.shape_cast %157 : vector<4x8xf32> to vector<4x8x1xf32>
    %159 = tpu.reciprocal %158 {approx = true} : vector<4x8x1xf32> -> vector<4x8x1xf32>
    %160 = vector.broadcast %159 : vector<4x8x1xf32> to vector<4x8x8xf32>
    %161 = arith.mulf %156, %160 : vector<4x8x8xf32>
    "tpu.trace_start"() <{level = 10 : i32, message = "hqk,hkd->hqd"}> : () -> ()
    %cst_79 = arith.constant dense<0.000000e+00> : vector<4x8x8xf32>
    %162 = tpu.matmul %161, %148, %cst_79 {dimension_numbers = #tpu.dot_dimension_numbers<[2], [1], [1], [2], [0, 0, 0, 1, 1, 2], [0], [0]>} : vector<4x8x8xf32>, vector<4x8x8xf32>, vector<4x8x8xf32> -> vector<4x8x8xf32>
    "tpu.trace_stop"() : () -> ()
    "tpu.trace_start"() <{level = 10 : i32, message = "hqd,hde->hqe"}> : () -> ()
    %cst_80 = arith.constant dense<0.000000e+00> : vector<4x8x32xf32>
    %163 = tpu.matmul %162, %9, %cst_80 {dimension_numbers = #tpu.dot_dimension_numbers<[2], [1], [1], [2], [0, 0, 0, 1, 1, 2], [0], [0]>} : vector<4x8x8xf32>, vector<4x8x32xf32>, vector<4x8x32xf32> -> vector<4x8x32xf32>
    "tpu.trace_stop"() : () -> ()
    %cst_81 = arith.constant dense<0.000000e+00> : vector<8x32xf32>
    %164 = vector.multi_reduction <add>, %163, %cst_81 [0] : vector<4x8x32xf32> to vector<8x32xf32>
    %165 = vector.broadcast %10 : vector<1x32xf32> to vector<8x32xf32>
    %166 = arith.addf %164, %165 : vector<8x32xf32>
    %167 = arith.addf %117, %166 : vector<8x32xf32>
    %cst_82 = arith.constant dense<0.000000e+00> : vector<8xf32>
    %168 = vector.multi_reduction <add>, %167, %cst_82 [1] : vector<8x32xf32> to vector<8xf32>
    %169 = vector.shape_cast %168 : vector<8xf32> to vector<8x1xf32>
    %cst_83 = arith.constant 3.200000e+01 : f32
    %170 = vector.broadcast %cst_83 : f32 to vector<8x1xf32>
    %171 = arith.divf %169, %170 : vector<8x1xf32>
    %172 = vector.broadcast %171 : vector<8x1xf32> to vector<8x32xf32>
    %173 = arith.subf %167, %172 : vector<8x32xf32>
    %174 = arith.mulf %173, %173 : vector<8x32xf32>
    %cst_84 = arith.constant dense<0.000000e+00> : vector<8xf32>
    %175 = vector.multi_reduction <add>, %174, %cst_84 [1] : vector<8x32xf32> to vector<8xf32>
    %176 = vector.shape_cast %175 : vector<8xf32> to vector<8x1xf32>
    %cst_85 = arith.constant 3.200000e+01 : f32
    %177 = vector.broadcast %cst_85 : f32 to vector<8x1xf32>
    %178 = arith.divf %176, %177 : vector<8x1xf32>
    %cst_86 = arith.constant 9.99999974E-6 : f32
    %179 = vector.broadcast %cst_86 : f32 to vector<8x1xf32>
    %180 = arith.addf %178, %179 : vector<8x1xf32>
    %181 = math.rsqrt %180 : vector<8x1xf32>
    %182 = vector.broadcast %181 : vector<8x1xf32> to vector<8x32xf32>
    %183 = arith.mulf %173, %182 : vector<8x32xf32>
    %184 = vector.broadcast %1 : vector<1x32xf32> to vector<8x32xf32>
    %185 = arith.mulf %183, %184 : vector<8x32xf32>
    %186 = vector.broadcast %2 : vector<1x32xf32> to vector<8x32xf32>
    %187 = arith.addf %185, %186 : vector<8x32xf32>
    %cst_87 = arith.constant dense<0.000000e+00> : vector<8x64xf32>
    %188 = tpu.matmul %187, %11, %cst_87 {dimension_numbers = #tpu.dot_dimension_numbers<[1], [0], [0], [1], [0, 0, 1, 1], [], []>} : vector<8x32xf32>, vector<32x64xf32>, vector<8x64xf32> -> vector<8x64xf32>
    %189 = vector.broadcast %12 : vector<1x64xf32> to vector<8x64xf32>
    %190 = arith.addf %188, %189 : vector<8x64xf32>
    %cst_88 = arith.constant 5.000000e-01 : f32
    %191 = vector.broadcast %cst_88 : f32 to vector<8x64xf32>
    %192 = arith.mulf %191, %190 : vector<8x64xf32>
    %cst_89 = arith.constant 0.707106769 : f32
    %193 = vector.broadcast %cst_89 : f32 to vector<8x64xf32>
    %194 = arith.mulf %190, %193 : vector<8x64xf32>
    %195 = math.erf %194 : vector<8x64xf32>
    %cst_90 = arith.constant 1.000000e+00 : f32
    %196 = vector.broadcast %cst_90 : f32 to vector<8x64xf32>
    %197 = arith.addf %196, %195 : vector<8x64xf32>
    %198 = arith.mulf %192, %197 : vector<8x64xf32>
    %cst_91 = arith.constant dense<0.000000e+00> : vector<8x32xf32>
    %199 = tpu.matmul %198, %13, %cst_91 {dimension_numbers = #tpu.dot_dimension_numbers<[1], [0], [0], [1], [0, 0, 1, 1], [], []>} : vector<8x64xf32>, vector<64x32xf32>, vector<8x32xf32> -> vector<8x32xf32>
    %200 = vector.broadcast %14 : vector<1x32xf32> to vector<8x32xf32>
    %201 = arith.addf %199, %200 : vector<8x32xf32>
    %202 = arith.addf %187, %201 : vector<8x32xf32>
    %c1_i32_92 = arith.constant 1 : i32
    %203 = vector.broadcast %c1_i32_92 : i32 to vector<8x2x32xi32>
    %204 = arith.cmpi eq, %15, %203 : vector<8x2x32xi32>
    %205 = vector.shape_cast %202 : vector<8x32xf32> to vector<8x1x32xf32>
    %206 = vector.shape_cast %205 : vector<8x1x32xf32> to vector<8x1x32xf32>
    %207 = vector.broadcast %206 : vector<8x1x32xf32> to vector<8x2x32xf32>
    %208 = arith.select %204, %207, %112 : vector<8x2x32xi1>, vector<8x2x32xf32>
    %c0_93 = arith.constant 0 : index
    %c0_94 = arith.constant 0 : index
    %c0_95 = arith.constant 0 : index
    %209 = vector.load %arg15[%c0_93, %c0_94, %c0_95] : memref<8x2x32xf32, #tpu.memory_space<vmem>>, vector<8x2x32xf32>
    tpu.vector_store %arg15[%c0_93, %c0_94, %c0_95], %208 {strides = array<i32>} : memref<8x2x32xf32, #tpu.memory_space<vmem>>, vector<8x2x32xf32>,
    return
  }
}

</mosaic_0001>

<bundles_post_ra>
// kernel: attention_block.1
= control target key start
LH: loop header
LB: loop body
LE: loop exit
PB: predicated region body
PF: predicated region fallthrough
CT: control target
= control target key end

     0   :  { %v140_v1 = vlaneseq  ;;  %s7404_s0 = inlined_call_operand.vmem [shape: f32[8,2,32], index: 0, kind: input, shape index: {}]   ;;  %s7405_s1 = inlined_call_operand.vmem [shape: f32[1,32], index: 1, kind: input, shape index: {}]   ;;  %s7406_s2 = inlined_call_operand.vmem [shape: f32[1,32], index: 2, kind: input, shape index: {}]   ;;  %s7407_s3 = inlined_call_operand.vmem [shape: f32[4,32,8], index: 3, kind: input, shape index: {}]   ;;  %s7408_s4 = inlined_call_operand.vmem [shape: f32[4,32,8], index: 4, kind: input, shape index: {}]   ;;  %s7409_s5 = inlined_call_operand.vmem [shape: f32[4,32,8], index: 5, kind: input, shape index: {}]   ;;  %s7410_s6 = inlined_call_operand.vmem [shape: f32[4,1,8], index: 6, kind: input, shape index: {}]   ;;  %s7411_s7 = inlined_call_operand.vmem [shape: f32[4,1,8], index: 7, kind: input, shape index: {}]   ;;  %s7412_s8 = inlined_call_operand.vmem [shape: f32[4,1,8], index: 8, kind: input, shape index: {}]   ;;  %s7413_s9 = inlined_call_operand.vmem [shape: f32[4,8,32], index: 9, kind: input, shape index: {}]   ;;  %s7414_s10 = inlined_call_operand.vmem [shape: f32[1,32], index: 10, kind: input, shape index: {}]   ;;  %s7415_s11 = inlined_call_operand.vmem [shape: f32[32,64], index: 11, kind: input, shape index: {}]   ;;  %s7416_s12 = inlined_call_operand.vmem [shape: f32[1,64], index: 12, kind: input, shape index: {}]   ;;  %s7417_s13 = inlined_call_operand.vmem [shape: f32[64,32], index: 13, kind: input, shape index: {}]   ;;  %s7418_s14 = inlined_call_operand.vmem [shape: f32[1,32], index: 14, kind: input, shape index: {}]   ;;  %s7419_s15 = inlined_call_operand.hbm [shape: f32[8,2,32], index: 15, kind: output, shape index: {}]  }
   0x1   :  { %v51_v0 = vld [vmem:[%s7404_s0] sm:$0x3]  ;;  %v52_v2 = vld [vmem:[%s7404_s0 + $0x2] sm:$0x3]  ;;  %v53_v3 = vld [vmem:[%s7404_s0 + $0x4] sm:$0x3] }
   0x2   :  { %v54_v4 = vld [vmem:[%s7404_s0 + $0x6] sm:$0x3]  ;;  %v55_v5 = vld [vmem:[%s7404_s0 + $0x8] sm:$0x3]  ;;  %v56_v6 = vld [vmem:[%s7404_s0 + $0xa] sm:$0x3] }
   0x3   :  { %v6012_v7 = vshrl.u32 %v140_v1, 7  ;;  %v57_v8 = vld [vmem:[%s7404_s0 + $0xc] sm:$0x3]  ;;  %v58_v9 = vld [vmem:[%s7404_s0 + $0xe] sm:$0x3] }
   0x4   :  { %20 = vsyncpa [#allocation3], 0  ;;  %vm151_vm1 = vcmask 254976   ;;  %vm216_vm2 = vcmask 1041409   ;;  %vm218_vm3 = vcmask 1042434   ;;  %vm220_vm4 = vcmask 1043459  }
   0x5   :  { %vm142_vm0 = vcmp.eq.s32.totalorder %v6012_v7, 0  ;;  %vm222_vm5 = vcmask 1044484   ;;  %vm224_vm6 = vcmask 1045509   ;;  %vm226_vm7 = vcmask 1046534  }
   0x6   :  { %v143_v10 = vsel %vm142_vm0, %v51_v0, 0.0  ;;  %v144_v11 = vsel %vm142_vm0, %v52_v2, 0.0  ;;  %v145_v12 = vsel %vm142_vm0, %v53_v3, 0.0  ;;  %v146_v13 = vsel %vm142_vm0, %v54_v4, 0.0 }
   0x7   :  { %v147_v14 = vsel %vm142_vm0, %v55_v5, 0.0  ;;  %v148_v15 = vsel %vm142_vm0, %v56_v6, 0.0  ;;  %v149_v16 = vsel %vm142_vm0, %v57_v8, 0.0  ;;  %v150_v17 = vsel %vm142_vm0, %v58_v9, 0.0 }
   0x8   :  { %v152_v18 = vsel %vm151_vm1, %v143_v10, 0.0  ;;  %v159_v19 = vsel %vm151_vm1, %v144_v11, 0.0  ;;  %v166_v20 = vsel %vm151_vm1, %v145_v12, 0.0  ;;  %v173_v21 = vsel %vm151_vm1, %v146_v13, 0.0 }
   0x9   :  { %v153_v22 = vrot.slane %v152_v18, 4  ;;  %v160_v23 = vrot.slane %v159_v19, 4  ;;  %v167_v24 = vrot.slane %v166_v20, 4  ;;  %v174_v25 = vrot.slane %v173_v21, 4 }
   0xa   :  { %v180_v26 = vsel %vm151_vm1, %v147_v14, 0.0  ;;  %v187_v27 = vsel %vm151_vm1, %v148_v15, 0.0  ;;  %v194_v28 = vsel %vm151_vm1, %v149_v16, 0.0  ;;  %v201_v29 = vsel %vm151_vm1, %v150_v17, 0.0 }
   0xb   :  { %v154_v30 = vadd.f32 %v153_v22, %v152_v18  ;;  %v161_v31 = vadd.f32 %v160_v23, %v159_v19  ;;  %v168_v32 = vadd.f32 %v167_v24, %v166_v20  ;;  %v175_v33 = vadd.f32 %v174_v25, %v173_v21 }
   0xc   :  { %v181_v34 = vrot.slane %v180_v26, 4  ;;  %v188_v35 = vrot.slane %v187_v27, 4  ;;  %v195_v36 = vrot.slane %v194_v28, 4  ;;  %v202_v37 = vrot.slane %v201_v29, 4 }
   0xd   :  { %v155_v38 = vrot.slane %v154_v30, 2  ;;  %v162_v39 = vrot.slane %v161_v31, 2  ;;  %v169_v40 = vrot.slane %v168_v32, 2  ;;  %v176_v41 = vrot.slane %v175_v33, 2 }
   0xe   :  { %v182_v42 = vadd.f32 %v181_v34, %v180_v26  ;;  %v189_v43 = vadd.f32 %v188_v35, %v187_v27  ;;  %v196_v44 = vadd.f32 %v195_v36, %v194_v28  ;;  %v203_v45 = vadd.f32 %v202_v37, %v201_v29 }
   0xf   :  { %v156_v46 = vadd.f32 %v155_v38, %v154_v30  ;;  %v163_v47 = vadd.f32 %v162_v39, %v161_v31  ;;  %v170_v48 = vadd.f32 %v169_v40, %v168_v32  ;;  %v177_v49 = vadd.f32 %v176_v41, %v175_v33 }
  0x10   :  { %v183_v50 = vrot.slane %v182_v42, 2  ;;  %v190_v51 = vrot.slane %v189_v43, 2  ;;  %v197_v52 = vrot.slane %v196_v44, 2  ;;  %v204_v53 = vrot.slane %v203_v45, 2 }
  0x11   :  { %v157_v54 = vrot.slane %v156_v46, 1  ;;  %v164_v55 = vrot.slane %v163_v47, 1  ;;  %v171_v56 = vrot.slane %v170_v48, 1  ;;  %v178_v57 = vrot.slane %v177_v49, 1 }
  0x12   :  { %v184_v58 = vadd.f32 %v183_v50, %v182_v42  ;;  %v191_v59 = vadd.f32 %v190_v51, %v189_v43  ;;  %v198_v60 = vadd.f32 %v197_v52, %v196_v44  ;;  %v205_v61 = vadd.f32 %v204_v53, %v203_v45 }
  0x13   :  { %v6045_v62 = vadd.f32 %v157_v54, %v156_v46  ;;  %v6047_v63 = vadd.f32 %v164_v55, %v163_v47  ;;  %v6049_v0 = vadd.f32 %v171_v56, %v170_v48  ;;  %v6051_v1 = vadd.f32 %v178_v57, %v177_v49 }
  0x14   :  { %v185_v2 = vrot.slane %v184_v58, 1  ;;  %v192_v3 = vrot.slane %v191_v59, 1  ;;  %v199_v4 = vrot.slane %v198_v60, 1  ;;  %v206_v5 = vrot.slane %v205_v61, 1 }
  0x15   :  { %v217_v6 = vsel %vm216_vm2, %v6047_v63, %v6045_v62  ;;  %vm228_vm8 = vcmask 1047559   ;;  %vm231_vm9 = vcmask 261120   ;;  %vm5910_vm10 = vmmov 0  }
  0x16   :  { %v6056_v8 = vadd.f32 %v185_v2, %v184_v58  ;;  %v6058_v9 = vadd.f32 %v192_v3, %v191_v59  ;;  %v6060_v10 = vadd.f32 %v199_v4, %v198_v60  ;;  %v219_v11 = vsel %vm218_vm3, %v6049_v0, %v217_v6  ;;  %v64_v59 = vld [vmem:[%s7407_s3 + $0x18] sm:$0xff]  ;;  %v63_v2 = vld [vmem:[%s7407_s3 + $0x10] sm:$0xff]  ;;  %v62_v4 = vld [vmem:[%s7407_s3 + $0x8] sm:$0xff] }
  0x17   :  { %v6064_v12 = vadd.f32 %v206_v5, %v205_v61  ;;  %v221_v13 = vsel %vm220_vm4, %v6051_v1, %v219_v11  ;;  %v68_v60 = vld [vmem:[%s7407_s3 + $0x38] sm:$0xff]  ;;  %v5909_v61 = vmov 0.0   ;;  %v67_v3 = vld [vmem:[%s7407_s3 + $0x30] sm:$0xff]  ;;  %v66_v5 = vld [vmem:[%s7407_s3 + $0x28] sm:$0xff]  ;;  %vm1286_vm11 = vcmask 64512  }
  0x18   :  { %v223_v14 = vsel %vm222_vm5, %v6056_v8, %v221_v13  ;;  %5317 = vmatprep.subr.mxu0 %v5909_v61  ;;  %5328 = vmatprep.subr.mxu1 %v5909_v61  ;;  %v61_v6 = vld [vmem:[%s7407_s3] sm:$0xff]  ;;  %vm2638_vm12 = vcmp.eq.s32.totalorder %v6012_v7, 1  ;;  %vm2500_vm13 = vcmask 523264  }
  0x19   :  { %v225_v15 = vsel %vm224_vm6, %v6058_v9, %v223_v14  ;;  %5318 = vmatpush3.msra.mxu0 %v64_v59  ;;  %5329 = vmatpush3.msra.mxu1 %v68_v60  ;;  %v65_v11 = vld [vmem:[%s7407_s3 + $0x20] sm:$0xff] }
  0x1a   :  { %v227_v16 = vsel %vm226_vm7, %v6060_v10, %v225_v15  ;;  %5319 = vmatprep.subr.mxu0 %v5909_v61  ;;  %5330 = vmatprep.subr.mxu1 %v5909_v61 }
  0x1b   :  { %v229_v17 = vsel %vm228_vm8, %v6064_v12, %v227_v16  ;;  %5320 = vmatpush3.msra.mxu0 %v63_v2  ;;  %5331 = vmatpush3.msra.mxu1 %v67_v3 }
  0x1c   :  { %v232_v18 = vsel %vm231_vm9, %v229_v17, 0.0  ;;  %5321 = vmatprep.subr.mxu0 %v5909_v61  ;;  %5332 = vmatprep.subr.mxu1 %v5909_v61  ;;  %v5044_v17 = vld [vmem:[%s7405_s1] ss:$0 sm:$0xff] }
  0x1d   :  { %233 = vadd.xlane.f32.xlu0 %v232_v18  ;;  %5322 = vmatpush3.msra.mxu0 %v62_v4  ;;  %v72_v4 = vld [vmem:[%s7407_s3 + $0x58] sm:$0xff] }
  0x1e   :  { %5333 = vmatpush3.msra.mxu1 %v66_v5  ;;  %5323 = vmatprep.subr.mxu0 %v5909_v61  ;;  %v76_v5 = vld [vmem:[%s7407_s3 + $0x78] sm:$0xff] }
  0x1f   :  { %5334 = vmatprep.subr.mxu1 %v5909_v61  ;;  %5324 = vmatpush3.msra.mxu0 %v61_v6 }
  0x20   :  { %5335 = vmatpush3.msra.mxu1 %v65_v11  ;;  %5325 = vmatprep.mubr.msk.f32.mxu0 %vm5910_vm10, %v5909_v61  ;;  %v71_v11 = vld [vmem:[%s7407_s3 + $0x50] sm:$0xff] }
  0x21   :  { %5336 = vmatprep.mubr.msk.f32.mxu1 %vm5910_vm10, %v5909_v61  ;;  %5339 = vmatprep.subr.mxu0 %v5909_v61 }
  0x22   :  { %5350 = vmatprep.subr.mxu1 %v5909_v61 }
  0xa6   :  { %v234_v19 = vpop.xlane.xlu0 %233 }
  0xa7   :  { %v236_v20 = vmul.f32 0.03125, %v234_v19 }
  0xa9   :  { %v238_v21 = vrot.slane %v236_v20, 1  ;;  %v239_v22 = vrot.slane %v236_v20, 2  ;;  %v240_v23 = vrot.slane %v236_v20, 3  ;;  %v241_v24 = vrot.slane %v236_v20, 4 }
  0xaa   :  { %v242_v25 = vrot.slane %v236_v20, 5  ;;  %v243_v26 = vrot.slane %v236_v20, 6  ;;  %v244_v27 = vrot.slane %v236_v20, 7  ;;  %v6078_v28 = vsub.f32 %v6045_v62, %v236_v20 }
  0xab   :  { %v6081_v29 = vsub.f32 %v6047_v63, %v238_v21  ;;  %v6084_v30 = vsub.f32 %v6049_v0, %v239_v22  ;;  %v6087_v31 = vsub.f32 %v6051_v1, %v240_v23  ;;  %v6090_v32 = vsub.f32 %v6056_v8, %v241_v24 }
  0xac   :  { %v6093_v33 = vsub.f32 %v6058_v9, %v242_v25  ;;  %v6096_v34 = vsub.f32 %v6060_v10, %v243_v26  ;;  %v6099_v35 = vsub.f32 %v6064_v12, %v244_v27  ;;  %v261_v40 = vmul.f32 %v6078_v28, %v6078_v28 }
  0xad   :  { %v262_v36 = vmul.f32 %v6081_v29, %v6081_v29  ;;  %v263_v37 = vmul.f32 %v6084_v30, %v6084_v30  ;;  %v264_v38 = vmul.f32 %v6087_v31, %v6087_v31  ;;  %v265_v39 = vmul.f32 %v6090_v32, %v6090_v32 }
  0xae   :  { %v266_v41 = vmul.f32 %v6093_v33, %v6093_v33  ;;  %v267_v44 = vmul.f32 %v6096_v34, %v6096_v34  ;;  %v268_v45 = vmul.f32 %v6099_v35, %v6099_v35 }
  0xaf   :  { %v277_v42 = vrot.slane %v262_v36, 7  ;;  %v279_v43 = vrot.slane %v263_v37, 6  ;;  %v281_v47 = vrot.slane %v264_v38, 5  ;;  %v283_v49 = vrot.slane %v265_v39, 4 }
  0xb0   :  { %v285_v51 = vrot.slane %v266_v41, 3  ;;  %v287_v53 = vrot.slane %v267_v44, 2  ;;  %v289_v55 = vrot.slane %v268_v45, 1 }
  0xb1   :  { %v278_v46 = vsel %vm216_vm2, %v277_v42, %v261_v40 }
  0xb2   :  { %v280_v48 = vsel %vm218_vm3, %v279_v43, %v278_v46 }
  0xb3   :  { %v282_v50 = vsel %vm220_vm4, %v281_v47, %v280_v48 }
  0xb4   :  { %v284_v52 = vsel %vm222_vm5, %v283_v49, %v282_v50 }
  0xb5   :  { %v286_v54 = vsel %vm224_vm6, %v285_v51, %v284_v52 }
  0xb6   :  { %v288_v56 = vsel %vm226_vm7, %v287_v53, %v286_v54 }
  0xb7   :  { %v290_v57 = vsel %vm228_vm8, %v289_v55, %v288_v56 }
  0xb8   :  { %v292_v58 = vsel %vm231_vm9, %v290_v57, 0.0 }
  0xb9   :  { %293 = vadd.xlane.f32.xlu0 %v292_v58 }
 0x142   :  { %v294_v13 = vpop.xlane.xlu0 %293 }
 0x143   :  { %v295_v14 = vmul.f32 0.03125, %v294_v13  ;;  %v75_v13 = vld [vmem:[%s7407_s3 + $0x70] sm:$0xff] }
 0x145   :  { %v296_v15 = vadd.f32 1e-05, %v295_v14  ;;  %v70_v14 = vld [vmem:[%s7407_s3 + $0x48] sm:$0xff] }
 0x147   :  { %5766 = vrsqrt.f32 %v296_v15  ;;  %v74_v15 = vld [vmem:[%s7407_s3 + $0x68] sm:$0xff] }
 0x154   :  { %v5767_v16 = vpop.eup %5766 }
 0x155   :  { %v299_v18 = vrot.slane %v5767_v16, 1  ;;  %v300_v19 = vrot.slane %v5767_v16, 2  ;;  %v301_v20 = vrot.slane %v5767_v16, 3  ;;  %v302_v21 = vrot.slane %v5767_v16, 4 }
 0x156   :  { %v303_v22 = vrot.slane %v5767_v16, 5  ;;  %v304_v23 = vrot.slane %v5767_v16, 6  ;;  %v305_v24 = vrot.slane %v5767_v16, 7  ;;  %v314_v25 = vmul.f32 %v5767_v16, %v6078_v28  ;;  %v5045_v28 = vld [vmem:[%s7406_s2] ss:$0 sm:$0xff] }
 0x157   :  { %v315_v26 = vmul.f32 %v299_v18, %v6081_v29  ;;  %v316_v27 = vmul.f32 %v300_v19, %v6084_v30  ;;  %v317_v36 = vmul.f32 %v301_v20, %v6087_v31  ;;  %v318_v37 = vmul.f32 %v302_v21, %v6090_v32  ;;  %v69_v16 = vld [vmem:[%s7407_s3 + $0x40] sm:$0xff]  ;;  %v80_v18 = vld [vmem:[%s7408_s4 + $0x18] sm:$0xff]  ;;  %v79_v20 = vld [vmem:[%s7408_s4 + $0x10] sm:$0xff] }
 0x158   :  { %v319_v38 = vmul.f32 %v303_v22, %v6093_v33  ;;  %v320_v39 = vmul.f32 %v304_v23, %v6096_v34  ;;  %v321_v40 = vmul.f32 %v305_v24, %v6099_v35  ;;  %v328_v41 = vmul.f32 %v5044_v17, %v314_v25  ;;  %v84_v19 = vld [vmem:[%s7408_s4 + $0x38] sm:$0xff]  ;;  %v83_v21 = vld [vmem:[%s7408_s4 + $0x30] sm:$0xff]  ;;  %v78_v22 = vld [vmem:[%s7408_s4 + $0x8] sm:$0xff] }
 0x159   :  { %v329_v42 = vmul.f32 %v5044_v17, %v315_v26  ;;  %v330_v43 = vmul.f32 %v5044_v17, %v316_v27  ;;  %v331_v44 = vmul.f32 %v5044_v17, %v317_v36  ;;  %v332_v45 = vmul.f32 %v5044_v17, %v318_v37  ;;  %v82_v23 = vld [vmem:[%s7408_s4 + $0x28] sm:$0xff]  ;;  %v77_v24 = vld [vmem:[%s7408_s4] sm:$0xff]  ;;  %v88_v26 = vld [vmem:[%s7408_s4 + $0x58] sm:$0xff] }
 0x15a   :  { %v333_v29 = vmul.f32 %v5044_v17, %v319_v38  ;;  %v334_v30 = vmul.f32 %v5044_v17, %v320_v39  ;;  %v335_v31 = vmul.f32 %v5044_v17, %v321_v40  ;;  %v342_v48 = vadd.f32 %v5045_v28, %v328_v41  ;;  %v73_v17 = vld [vmem:[%s7407_s3 + $0x60] sm:$0xff]  ;;  %v92_v27 = vld [vmem:[%s7408_s4 + $0x78] sm:$0xff]  ;;  %v87_v36 = vld [vmem:[%s7408_s4 + $0x50] sm:$0xff] }
 0x15b   :  { %v343_v46 = vadd.f32 %v5045_v28, %v329_v42  ;;  %v344_v32 = vadd.f32 %v5045_v28, %v330_v43  ;;  %v345_v47 = vadd.f32 %v5045_v28, %v331_v44  ;;  %v346_v33 = vadd.f32 %v5045_v28, %v332_v45  ;;  %v81_v25 = vld [vmem:[%s7408_s4 + $0x20] sm:$0xff]  ;;  %v91_v37 = vld [vmem:[%s7408_s4 + $0x70] sm:$0xff]  ;;  %v86_v38 = vld [vmem:[%s7408_s4 + $0x48] sm:$0xff] }
 0x15c   :  { %v347_v34 = vadd.f32 %v5045_v28, %v333_v29  ;;  %v348_v50 = vadd.f32 %v5045_v28, %v334_v30  ;;  %v349_v51 = vadd.f32 %v5045_v28, %v335_v31  ;;  %v90_v39 = vld [vmem:[%s7408_s4 + $0x68] sm:$0xff]  ;;  %v85_v40 = vld [vmem:[%s7408_s4 + $0x40] sm:$0xff]  ;;  %v96_v42 = vld [vmem:[%s7409_s5 + $0x18] sm:$0xff] }
 0x15d   :  { %v382_v49 = vrot.slane %v343_v46, 7  ;;  %v384_v35 = vrot.slane %v344_v32, 6  ;;  %v386_v53 = vrot.slane %v345_v47, 5  ;;  %v388_v55 = vrot.slane %v346_v33, 4  ;;  %v89_v41 = vld [vmem:[%s7408_s4 + $0x60] sm:$0xff]  ;;  %v100_v43 = vld [vmem:[%s7409_s5 + $0x38] sm:$0xff] }
 0x15e   :  { %v390_v57 = vrot.slane %v347_v34, 3  ;;  %v392_v59 = vrot.slane %v348_v50, 2  ;;  %v394_v2 = vrot.slane %v349_v51, 1  ;;  %v95_v44 = vld [vmem:[%s7409_s5 + $0x10] sm:$0xff]  ;;  %v94_v28 = vld [vmem:[%s7409_s5 + $0x8] sm:$0xff]  ;;  %v93_v30 = vld [vmem:[%s7409_s5] sm:$0xff] }
 0x15f   :  { %v383_v52 = vsel %vm216_vm2, %v382_v49, %v342_v48  ;;  %v99_v45 = vld [vmem:[%s7409_s5 + $0x30] sm:$0xff]  ;;  %v98_v29 = vld [vmem:[%s7409_s5 + $0x28] sm:$0xff]  ;;  %v97_v31 = vld [vmem:[%s7409_s5 + $0x20] sm:$0xff] }
 0x160   :  { %v385_v54 = vsel %vm218_vm3, %v384_v35, %v383_v52  ;;  %v104_v46 = vld [vmem:[%s7409_s5 + $0x58] sm:$0xff]  ;;  %v103_v47 = vld [vmem:[%s7409_s5 + $0x50] sm:$0xff]  ;;  %v102_v48 = vld [vmem:[%s7409_s5 + $0x48] sm:$0xff] }
 0x161   :  { %v387_v56 = vsel %vm220_vm4, %v386_v53, %v385_v54  ;;  %v108_v32 = vld [vmem:[%s7409_s5 + $0x78] sm:$0xff]  ;;  %v107_v33 = vld [vmem:[%s7409_s5 + $0x70] sm:$0xff]  ;;  %v106_v34 = vld [vmem:[%s7409_s5 + $0x68] sm:$0xff] }
 0x162   :  { %v389_v58 = vsel %vm222_vm5, %v388_v55, %v387_v56  ;;  %v101_v49 = vld [vmem:[%s7409_s5 + $0x40] sm:$0xff] }
 0x163   :  { %v391_v60 = vsel %vm224_vm6, %v390_v57, %v389_v58  ;;  %v105_v35 = vld [vmem:[%s7409_s5 + $0x60] sm:$0xff] }
 0x164   :  { %v393_v3 = vsel %vm226_vm7, %v392_v59, %v391_v60  ;;  %v5054_v58 = vld [vmem:[%s7411_s7] ss:$0 sm:$0xff] }
 0x165   :  { %v6190_v6 = vsel %vm228_vm8, %v394_v2, %v393_v3  ;;  %v5046_v2 = vld [vmem:[%s7410_s6] ss:$0 sm:$0xff] }
 0x166   :  { %5326 = vmatmul.mubr.msk.f32.vlgmr.msra.gmra.mxu0 %vm231_vm9, %v6190_v6  ;;  %5337 = vmatmul.mubr.msk.f32.vlgmr.msra.gmra.mxu1 %vm231_vm9, %v6190_v6 }
 0x167   :  { %5340 = vmatpush3.msra.mxu0 %v72_v4  ;;  %5351 = vmatpush3.msra.mxu1 %v76_v5  ;;  %v5055_v4 = vld [vmem:[%s7411_s7 + $0x1] ss:$0 sm:$0xff] }
 0x168   :  { %5341 = vmatprep.subr.mxu0 %v5909_v61  ;;  %5352 = vmatprep.subr.mxu1 %v5909_v61 }
 0x169   :  { %5342 = vmatpush3.msra.mxu0 %v71_v11  ;;  %5353 = vmatpush3.msra.mxu1 %v75_v13  ;;  %v5047_v13 = vld [vmem:[%s7410_s6 + $0x1] ss:$0 sm:$0xff] }
 0x16a   :  { %5343 = vmatprep.subr.mxu0 %v5909_v61  ;;  %5354 = vmatprep.subr.mxu1 %v5909_v61 }
 0x16b   :  { %5344 = vmatpush3.msra.mxu0 %v70_v14  ;;  %5355 = vmatpush3.msra.mxu1 %v74_v15 }
 0x16c   :  { %5345 = vmatprep.subr.mxu0 %v5909_v61  ;;  %5356 = vmatprep.subr.mxu1 %v5909_v61 }
 0x16d   :  { %5346 = vmatpush3.msra.mxu0 %v69_v16  ;;  %5347 = vmatprep.mubr.msk.f32.mxu0 %vm5910_vm10, %v5909_v61  ;;  %v5056_v16 = vld [vmem:[%s7411_s7 + $0x2] ss:$0 sm:$0xff] }
 0x16e   :  { %5357 = vmatpush3.msra.mxu1 %v73_v17  ;;  %5358 = vmatprep.mubr.msk.f32.mxu1 %vm5910_vm10, %v5909_v61  ;;  %v5057_v17 = vld [vmem:[%s7411_s7 + $0x3] ss:$0 sm:$0xff] }
 0x16f   :  { %5348 = vmatmul.mubr.msk.f32.vlgmr.msra.gmra.mxu0 %vm231_vm9, %v6190_v6  ;;  %5359 = vmatmul.mubr.msk.f32.vlgmr.msra.gmra.mxu1 %vm231_vm9, %v6190_v6 }
 0x170   :  { %5361 = vmatprep.subr.mxu0 %v5909_v61  ;;  %5372 = vmatprep.subr.mxu1 %v5909_v61 }
 0x171   :  { %5362 = vmatpush3.msra.mxu0 %v80_v18  ;;  %5373 = vmatpush3.msra.mxu1 %v84_v19 }
 0x172   :  { %5363 = vmatprep.subr.mxu0 %v5909_v61  ;;  %5374 = vmatprep.subr.mxu1 %v5909_v61 }
 0x173   :  { %5364 = vmatpush3.msra.mxu0 %v79_v20  ;;  %5375 = vmatpush3.msra.mxu1 %v83_v21  ;;  %v5048_v20 = vld [vmem:[%s7410_s6 + $0x2] ss:$0 sm:$0xff]  ;;  %v5049_v21 = vld [vmem:[%s7410_s6 + $0x3] ss:$0 sm:$0xff] }
 0x174   :  { %5365 = vmatprep.subr.mxu0 %v5909_v61  ;;  %5376 = vmatprep.subr.mxu1 %v5909_v61 }
 0x175   :  { %5366 = vmatpush3.msra.mxu0 %v78_v22  ;;  %5377 = vmatpush3.msra.mxu1 %v82_v23 }
 0x176   :  { %5367 = vmatprep.subr.mxu0 %v5909_v61  ;;  %5378 = vmatprep.subr.mxu1 %v5909_v61 }
 0x177   :  { %5368 = vmatpush3.msra.mxu0 %v77_v24  ;;  %5369 = vmatprep.mubr.msk.f32.mxu0 %vm5910_vm10, %v5909_v61 }
 0x178   :  { %5379 = vmatpush3.msra.mxu1 %v81_v25  ;;  %5380 = vmatprep.mubr.msk.f32.mxu1 %vm5910_vm10, %v5909_v61 }
 0x179   :  { %5370 = vmatmul.mubr.msk.f32.vlgmr.msra.gmra.mxu0 %vm231_vm9, %v6190_v6  ;;  %5381 = vmatmul.mubr.msk.f32.vlgmr.msra.gmra.mxu1 %vm231_vm9, %v6190_v6 }
 0x17a   :  { %5383 = vmatprep.subr.mxu0 %v5909_v61  ;;  %5394 = vmatprep.subr.mxu1 %v5909_v61 }
 0x17b   :  { %5384 = vmatpush3.msra.mxu0 %v88_v26  ;;  %5395 = vmatpush3.msra.mxu1 %v92_v27 }
 0x17c   :  { %5385 = vmatprep.subr.mxu0 %v5909_v61  ;;  %5396 = vmatprep.subr.mxu1 %v5909_v61 }
 0x17d   :  { %5386 = vmatpush3.msra.mxu0 %v87_v36  ;;  %5397 = vmatpush3.msra.mxu1 %v91_v37  ;;  %v5062_v36 = vld [vmem:[%s7412_s8] ss:$0 sm:$0xff]  ;;  %v5063_v37 = vld [vmem:[%s7412_s8 + $0x1] ss:$0 sm:$0xff] }
 0x17e   :  { %5387 = vmatprep.subr.mxu0 %v5909_v61  ;;  %5398 = vmatprep.subr.mxu1 %v5909_v61 }
 0x17f   :  { %5388 = vmatpush3.msra.mxu0 %v86_v38  ;;  %5399 = vmatpush3.msra.mxu1 %v90_v39 }
 0x180   :  { %5389 = vmatprep.subr.mxu0 %v5909_v61  ;;  %5400 = vmatprep.subr.mxu1 %v5909_v61 }
 0x181   :  { %5390 = vmatpush3.msra.mxu0 %v85_v40  ;;  %5391 = vmatprep.mubr.msk.f32.mxu0 %vm5910_vm10, %v5909_v61 }
 0x182   :  { %5401 = vmatpush3.msra.mxu1 %v89_v41  ;;  %5402 = vmatprep.mubr.msk.f32.mxu1 %vm5910_vm10, %v5909_v61 }
 0x183   :  { %5392 = vmatmul.mubr.msk.f32.vlgmr.msra.gmra.mxu0 %vm231_vm9, %v6190_v6  ;;  %5403 = vmatmul.mubr.msk.f32.vlgmr.msra.gmra.mxu1 %vm231_vm9, %v6190_v6 }
 0x184   :  { %5405 = vmatprep.subr.mxu0 %v5909_v61  ;;  %5416 = vmatprep.subr.mxu1 %v5909_v61 }
 0x185   :  { %5406 = vmatpush3.msra.mxu0 %v96_v42  ;;  %5417 = vmatpush3.msra.mxu1 %v100_v43 }
 0x186   :  { %5407 = vmatprep.subr.mxu0 %v5909_v61  ;;  %5418 = vmatprep.subr.mxu1 %v5909_v61 }
 0x187   :  { %5408 = vmatpush3.msra.mxu0 %v95_v44  ;;  %5419 = vmatpush3.msra.mxu1 %v99_v45 }
 0x188   :  { %5409 = vmatprep.subr.mxu0 %v5909_v61  ;;  %5420 = vmatprep.subr.mxu1 %v5909_v61 }
 0x189   :  { %5410 = vmatpush3.msra.mxu0 %v94_v28  ;;  %5421 = vmatpush3.msra.mxu1 %v98_v29 }
 0x18a   :  { %5411 = vmatprep.subr.mxu0 %v5909_v61  ;;  %5422 = vmatprep.subr.mxu1 %v5909_v61 }
 0x18b   :  { %5412 = vmatpush3.msra.mxu0 %v93_v30  ;;  %5413 = vmatprep.mubr.msk.f32.mxu0 %vm5910_vm10, %v5909_v61 }
 0x18c   :  { %5423 = vmatpush3.msra.mxu1 %v97_v31  ;;  %5424 = vmatprep.mubr.msk.f32.mxu1 %vm5910_vm10, %v5909_v61 }
 0x18d   :  { %5414 = vmatmul.mubr.msk.f32.vlgmr.msra.gmra.mxu0 %vm231_vm9, %v6190_v6  ;;  %5425 = vmatmul.mubr.msk.f32.vlgmr.msra.gmra.mxu1 %vm231_vm9, %v6190_v6 }
 0x18e   :  { %5427 = vmatprep.subr.mxu0 %v5909_v61  ;;  %5438 = vmatprep.subr.mxu1 %v5909_v61 }
 0x18f   :  { %5428 = vmatpush3.msra.mxu0 %v104_v46  ;;  %5439 = vmatpush3.msra.mxu1 %v108_v32 }
 0x190   :  { %5429 = vmatprep.subr.mxu0 %v5909_v61  ;;  %5440 = vmatprep.subr.mxu1 %v5909_v61 }
 0x191   :  { %5430 = vmatpush3.msra.mxu0 %v103_v47  ;;  %5441 = vmatpush3.msra.mxu1 %v107_v33 }
 0x192   :  { %5431 = vmatprep.subr.mxu0 %v5909_v61  ;;  %5442 = vmatprep.subr.mxu1 %v5909_v61 }
 0x193   :  { %5432 = vmatpush3.msra.mxu0 %v102_v48  ;;  %5443 = vmatpush3.msra.mxu1 %v106_v34 }
 0x194   :  { %5433 = vmatprep.subr.mxu0 %v5909_v61  ;;  %5444 = vmatprep.subr.mxu1 %v5909_v61 }
 0x195   :  { %5434 = vmatpush3.msra.mxu0 %v101_v49  ;;  %5435 = vmatprep.mubr.msk.f32.mxu0 %vm5910_vm10, %v5909_v61 }
 0x196   :  { %5445 = vmatpush3.msra.mxu1 %v105_v35  ;;  %5446 = vmatprep.mubr.msk.f32.mxu1 %vm5910_vm10, %v5909_v61 }
 0x197   :  { %5436 = vmatmul.mubr.msk.f32.vlgmr.msra.gmra.mxu0 %vm231_vm9, %v6190_v6  ;;  %5447 = vmatmul.mubr.msk.f32.vlgmr.msra.gmra.mxu1 %vm231_vm9, %v6190_v6 }
 0x198   :  { %5449 = vmatprep.subr.mxu0 %v5909_v61  ;;  %5451 = vmatprep.mubr.msk.f32.mxu0 %vm5910_vm10, %v5909_v61 }
 0x199   :  { %5464 = vmatprep.subr.mxu1 %v5909_v61  ;;  %5466 = vmatprep.mubr.msk.f32.mxu1 %vm5910_vm10, %v5909_v61 }
 0x226   :  { %v464_v50 = vpop.f32.mrf.mxu0  ;;  %v534_v51 = vpop.f32.mrf.mxu1 }
 0x227   :  { %v465_v11 = vadd.f32 %v5046_v2, %v464_v50  ;;  %v535_v15 = vadd.f32 %v5047_v13, %v534_v51 }
 0x228   :  { %v5327_v52 = vpop.f32.mrf.mxu0  ;;  %v5338_v53 = vpop.f32.mrf.mxu1 }
 0x22f   :  { %v604_v54 = vpop.f32.mrf.mxu0  ;;  %v674_v55 = vpop.f32.mrf.mxu1 }
 0x230   :  { %v605_v26 = vadd.f32 %v5048_v20, %v604_v54  ;;  %v675_v27 = vadd.f32 %v5049_v21, %v674_v55 }
 0x231   :  { %v5349_v56 = vpop.f32.mrf.mxu0  ;;  %v5360_v57 = vpop.f32.mrf.mxu1 }
 0x239   :  { %v768_v59 = vpop.f32.mrf.mxu0  ;;  %v838_v60 = vpop.f32.mrf.mxu1 }
 0x23a   :  { %v769_v3 = vadd.f32 %v5054_v58, %v768_v59  ;;  %v839_v14 = vadd.f32 %v5055_v4, %v838_v60 }
 0x23b   :  { %v5371_v5 = vpop.f32.mrf.mxu0  ;;  %v5382_v6 = vpop.f32.mrf.mxu1 }
 0x23c   :  { %5450 = vmatpush3.xpose.msk.msra.mxu0 %vm1286_vm11, %v769_v3 }
 0x23d   :  { %5454 = vmatprep.subr.mxu0 %v5909_v61 }
 0x23f   :  { %5452 = vmatmul.mubr.msk.f32.vlgmr.msra.gmra.mxu0 %vm1286_vm11, %v465_v11 }
 0x240   :  { %5455 = vmatpush3.xpose.msk.msra.mxu0 %vm1286_vm11, %v839_v14  ;;  %5456 = vmatprep.mubr.msk.f32.mxu0 %vm5910_vm10, %v5909_v61 }
 0x241   :  { %5459 = vmatprep.subr.mxu0 %v5909_v61 }
 0x243   :  { %v908_v18 = vpop.f32.mrf.mxu0  ;;  %v978_v19 = vpop.f32.mrf.mxu1  ;;  %5457 = vmatmul.mubr.msk.f32.vlgmr.msra.gmra.mxu0 %vm1286_vm11, %v535_v15 }
 0x244   :  { %v909_v22 = vadd.f32 %v5056_v16, %v908_v18  ;;  %v979_v23 = vadd.f32 %v5057_v17, %v978_v19  ;;  %5461 = vmatprep.mubr.msk.f32.mxu0 %vm5910_vm10, %v5909_v61 }
 0x245   :  { %v5393_v24 = vpop.f32.mrf.mxu0  ;;  %v5404_v25 = vpop.f32.mrf.mxu1 }
 0x246   :  { %5460 = vmatpush3.xpose.msk.msra.mxu0 %vm1286_vm11, %v909_v22  ;;  %5465 = vmatpush3.xpose.msk.msra.mxu1 %vm1286_vm11, %v979_v23 }
 0x247   :  { %5469 = vmatprep.subr.mxu0 %v5909_v61  ;;  %5474 = vmatprep.subr.mxu1 %v5909_v61 }
 0x249   :  { %5462 = vmatmul.mubr.msk.f32.vlgmr.msra.gmra.mxu0 %vm1286_vm11, %v605_v26  ;;  %5467 = vmatmul.mubr.msk.f32.vlgmr.msra.gmra.mxu1 %vm1286_vm11, %v675_v27  ;;  %v5064_v26 = vld [vmem:[%s7412_s8 + $0x2] ss:$0 sm:$0xff] }
 0x24a   :  { %5471 = vmatprep.mubr.msk.f32.mxu0 %vm5910_vm10, %v5909_v61  ;;  %5476 = vmatprep.mubr.msk.f32.mxu1 %vm5910_vm10, %v5909_v61 }
 0x24d   :  { %v1072_v38 = vpop.f32.mrf.mxu0  ;;  %v1142_v39 = vpop.f32.mrf.mxu1 }
 0x24e   :  { %v1073_v40 = vadd.f32 %v5062_v36, %v1072_v38  ;;  %v1143_v41 = vadd.f32 %v5063_v37, %v1142_v39  ;;  %v5065_v38 = vld [vmem:[%s7412_s8 + $0x3] ss:$0 sm:$0xff] }
 0x24f   :  { %v5415_v42 = vpop.f32.mrf.mxu0  ;;  %v5426_v43 = vpop.f32.mrf.mxu1 }
 0x250   :  { %5470 = vmatpush3.msra.mxu0 %v1073_v40  ;;  %5475 = vmatpush3.msra.mxu1 %v1143_v41 }
 0x251   :  { %5479 = vmatprep.subr.mxu0 %v5909_v61  ;;  %5484 = vmatprep.subr.mxu1 %v5909_v61 }
 0x257   :  { %v6446_v44 = vpop.f32.mrf.mxu0  ;;  %v6448_v45 = vpop.f32.mrf.mxu1 }
 0x258   :  { %v1213_v37 = vadd.f32 %v5064_v26, %v6446_v44  ;;  %v1283_v41 = vadd.f32 %v5065_v38, %v6448_v45  ;;  %v121_v45 = vld [vmem:[%s7413_s9] sm:$0xff] }
 0x259   :  { %v5437_v28 = vpop.f32.mrf.mxu0  ;;  %v5448_v29 = vpop.f32.mrf.mxu1 }
 0x25a   :  { %v122_v29 = vld [vmem:[%s7413_s9 + $0x8] sm:$0xff] }
 0x2ff   :  { %v1359_v30 = vpop.f32.mrf.mxu0 }
 0x300   :  { %v1591_v31 = vmul.f32 0.35355338, %v1359_v30  ;;  %v123_v30 = vld [vmem:[%s7413_s9 + $0x10] sm:$0xff] }
 0x301   :  { %v5453_v46 = vpop.f32.mrf.mxu0 }
 0x302   :  { %v1595_v32 = vsel %vm1286_vm11, %v1591_v31, -inf }
 0x303   :  { %1596 = vmax.xlane.f32.xlu1 %v1595_v32  ;;  %v1435_v47 = vpop.f32.mrf.mxu0  ;;  %v124_v32 = vld [vmem:[%s7413_s9 + $0x18] sm:$0xff] }
 0x304   :  { %v1592_v33 = vmul.f32 0.35355338, %v1435_v47 }
 0x305   :  { %v5458_v48 = vpop.f32.mrf.mxu0 }
 0x306   :  { %v1598_v34 = vsel %vm1286_vm11, %v1592_v33, -inf }
 0x307   :  { %1599 = vmax.xlane.f32.xlu1 %v1598_v34 }
 0x309   :  { %v1587_v49 = vpop.f32.mrf.mxu1  ;;  %v1511_v35 = vpop.f32.mrf.mxu0 }
 0x30a   :  { %v1594_v50 = vmul.f32 0.35355338, %v1587_v49  ;;  %v1593_v51 = vmul.f32 0.35355338, %v1511_v35 }
 0x30b   :  { %v5463_v52 = vpop.f32.mrf.mxu0  ;;  %v5468_v53 = vpop.f32.mrf.mxu1 }
 0x30c   :  { %v1604_v54 = vsel %vm1286_vm11, %v1594_v50, -inf  ;;  %v1601_v55 = vsel %vm1286_vm11, %v1593_v51, -inf  ;;  %v5811_v52 = vld [vmem:[%s7404_s0 + $0x2] sm:$0x3] }
 0x30d   :  { %1605 = vmax.xlane.f32.xlu1 %v1604_v54  ;;  %1602 = vmax.xlane.f32.xlu0 %v1601_v55  ;;  %v2640_v53 = vsel %vm2638_vm12, %v5811_v52, 0.0  ;;  %v5812_v54 = vld [vmem:[%s7404_s0 + $0x4] sm:$0x3] }
 0x30e   :  { %v2641_v55 = vsel %vm2638_vm12, %v5812_v54, 0.0 }
 0x38c   :  { %v1597_v56 = vpop.xlane.xlu1 %1596 }
 0x38d   :  { %v1607_v57 = vsub.f32 %v1591_v31, %v1597_v56 }
 0x38f   :  { %v1611_v58 = vmul.f32 1.442695, %v1607_v57  ;;  %v2654_v57 = vsel %vm151_vm1, %v2640_v53, 0.0 }
 0x390   :  { %v1600_v59 = vpop.xlane.xlu1 %1599 }
 0x391   :  { %5768 = vpow2.f32 %v1611_v58  ;;  %v1608_v60 = vsub.f32 %v1592_v33, %v1600_v59  ;;  %v5813_v58 = vld [vmem:[%s7404_s0 + $0x6] sm:$0x3] }
 0x392   :  { %v2642_v59 = vsel %vm2638_vm12, %v5813_v58, 0.0 }
 0x393   :  { %v1613_v2 = vmul.f32 1.442695, %v1608_v60 }
 0x395   :  { %5770 = vpow2.f32 %v1613_v2  ;;  %v2655_v2 = vrot.slane %v2654_v57, 4 }
 0x396   :  { %v1606_v3 = vpop.xlane.xlu1 %1605  ;;  %v1603_v4 = vpop.xlane.xlu0 %1602 }
 0x397   :  { %v1610_v5 = vsub.f32 %v1594_v50, %v1606_v3  ;;  %v1609_v6 = vsub.f32 %v1593_v51, %v1603_v4  ;;  %v5810_v50 = vld [vmem:[%s7404_s0] sm:$0x3]  ;;  %v2661_v3 = vsel %vm151_vm1, %v2641_v55, 0.0 }
 0x398   :  { %v2639_v51 = vsel %vm2638_vm12, %v5810_v50, 0.0  ;;  %v2662_v4 = vrot.slane %v2661_v3, 4 }
 0x399   :  { %v1617_v11 = vmul.f32 1.442695, %v1610_v5  ;;  %v1615_v13 = vmul.f32 1.442695, %v1609_v6  ;;  %v2647_v56 = vsel %vm151_vm1, %v2639_v51, 0.0  ;;  %v2668_v5 = vsel %vm151_vm1, %v2642_v59, 0.0 }
 0x39a   :  { %v2648_v60 = vrot.slane %v2647_v56, 4  ;;  %v5814_v6 = vld [vmem:[%s7404_s0 + $0x8] sm:$0x3] }
 0x39b   :  { %5772 = vpow2.f32 %v1617_v11  ;;  %v2643_v11 = vsel %vm2638_vm12, %v5814_v6, 0.0 }
 0x39c   :  { %5774 = vpow2.f32 %v1615_v13  ;;  %v2649_v13 = vadd.f32 %v2648_v60, %v2647_v56 }
 0x39e   :  { %v5769_v14 = vpop.eup %5768 }
 0x39f   :  { %v1619_v15 = vsel %vm1286_vm11, %v5769_v14, 0.0 }
 0x3a0   :  { %1620 = vadd.xlane.f32.xlu0 %v1619_v15  ;;  %v5815_v15 = vld [vmem:[%s7404_s0 + $0xa] sm:$0x3] }
 0x3a2   :  { %v5771_v16 = vpop.eup %5770 }
 0x3a3   :  { %v1622_v17 = vsel %vm1286_vm11, %v5771_v16, 0.0 }
 0x3a4   :  { %1623 = vadd.xlane.f32.xlu1 %v1622_v17  ;;  %v2669_v17 = vrot.slane %v2668_v5, 4 }
 0x3a8   :  { %v5773_v18 = vpop.eup %5772 }
 0x3a9   :  { %v5775_v19 = vpop.eup %5774  ;;  %v1628_v20 = vsel %vm1286_vm11, %v5773_v18, 0.0 }
 0x3aa   :  { %1629 = vadd.xlane.f32.xlu1 %v1628_v20  ;;  %v1625_v21 = vsel %vm1286_vm11, %v5775_v19, 0.0  ;;  %v2650_v20 = vrot.slane %v2649_v13, 2 }
 0x3ab   :  { %1626 = vadd.xlane.f32.xlu0 %v1625_v21 }
 0x429   :  { %v1621_v22 = vpop.xlane.xlu0 %1620 }
 0x42a   :  { %5776 = vrcp.f32 %v1621_v22  ;;  %v5816_v22 = vld [vmem:[%s7404_s0 + $0xc] sm:$0x3] }
 0x42d   :  { %v1624_v23 = vpop.xlane.xlu1 %1623 }
 0x42e   :  { %5778 = vrcp.f32 %v1624_v23  ;;  %v2645_v23 = vsel %vm2638_vm12, %v5816_v22, 0.0 }
 0x433   :  { %v1630_v24 = vpop.xlane.xlu1 %1629 }
 0x434   :  { %5780 = vrcp.f32 %v1630_v24  ;;  %v1627_v25 = vpop.xlane.xlu0 %1626 }
 0x435   :  { %5782 = vrcp.f32 %v1627_v25  ;;  %v2670_v25 = vadd.f32 %v2669_v17, %v2668_v5 }
 0x437   :  { %v5777_v27 = vpop.eup %5776 }
 0x438   :  { %v1635_v36 = vmul.f32 %v5777_v27, %v5769_v14  ;;  %v2656_v14 = vadd.f32 %v2655_v2, %v2654_v57  ;;  %v5817_v27 = vld [vmem:[%s7404_s0 + $0xe] sm:$0x3] }
 0x43a   :  { %5472 = vmatmul.mubr.msk.f32.vlgmr.msra.gmra.mxu0 %vm1286_vm11, %v1635_v36  ;;  %v2657_v21 = vrot.slane %v2656_v14, 2  ;;  %v2646_v36 = vsel %vm2638_vm12, %v5817_v27, 0.0 }
 0x43b   :  { %v5779_v39 = vpop.eup %5778  ;;  %5480 = vmatpush3.msra.mxu0 %v1213_v37  ;;  %5481 = vmatprep.mubr.msk.f32.mxu0 %vm5910_vm10, %v5909_v61 }
 0x43c   :  { %v1636_v40 = vmul.f32 %v5779_v39, %v5771_v16  ;;  %5489 = vmatprep.subr.mxu0 %v5909_v61  ;;  %v2644_v16 = vsel %vm2638_vm12, %v5815_v15, 0.0  ;;  %v2651_v39 = vadd.f32 %v2650_v20, %v2649_v13 }
 0x43d   :  { %v2682_v24 = vsel %vm151_vm1, %v2644_v16, 0.0  ;;  %v5086_v16 = vld [vmem:[%s7414_s10] ss:$0 sm:$0xff] }
 0x43e   :  { %5477 = vmatmul.mubr.msk.f32.vlgmr.msra.gmra.mxu1 %vm1286_vm11, %v1636_v40  ;;  %v2658_v40 = vadd.f32 %v2657_v21, %v2656_v14 }
 0x43f   :  { %5485 = vmatpush3.msra.mxu1 %v1283_v41  ;;  %5486 = vmatprep.mubr.msk.f32.mxu1 %vm5910_vm10, %v5909_v61  ;;  %v2683_v41 = vrot.slane %v2682_v24, 4 }
 0x440   :  { %5494 = vmatprep.subr.mxu1 %v5909_v61 }
 0x441   :  { %v5781_v42 = vpop.eup %5780 }
 0x442   :  { %v5783_v43 = vpop.eup %5782  ;;  %v1638_v44 = vmul.f32 %v5781_v42, %v5773_v18  ;;  %v2663_v18 = vadd.f32 %v2662_v4, %v2661_v3  ;;  %v2689_v42 = vsel %vm151_vm1, %v2645_v23, 0.0 }
 0x443   :  { %v1637_v28 = vmul.f32 %v5783_v43, %v5775_v19  ;;  %v2675_v19 = vsel %vm151_vm1, %v2643_v11, 0.0 }
 0x444   :  { %5487 = vmatmul.mubr.msk.f32.vlgmr.msra.gmra.mxu1 %vm1286_vm11, %v1638_v44  ;;  %v2676_v26 = vrot.slane %v2675_v19, 4  ;;  %v2664_v37 = vrot.slane %v2663_v18, 2  ;;  %v2671_v44 = vrot.slane %v2670_v25, 2 }
 0x445   :  { %5482 = vmatmul.mubr.msk.f32.vlgmr.msra.gmra.mxu0 %vm1286_vm11, %v1637_v28  ;;  %5496 = vmatprep.mubr.msk.f32.mxu1 %vm5910_vm10, %v5909_v61 }
 0x446   :  { %5491 = vmatprep.mubr.msk.f32.mxu0 %vm5910_vm10, %v5909_v61  ;;  %5490 = vmatpush3.msra.mxu0 %v121_v45  ;;  %v2677_v28 = vadd.f32 %v2676_v26, %v2675_v19  ;;  %v2665_v45 = vadd.f32 %v2664_v37, %v2663_v18 }
 0x447   :  { %5499 = vmatprep.subr.mxu0 %v5909_v61  ;;  %5495 = vmatpush3.msra.mxu1 %v122_v29  ;;  %v2690_v29 = vrot.slane %v2689_v42, 4 }
 0x448   :  { %5504 = vmatprep.subr.mxu1 %v5909_v61 }
 0x449   :  { %v2691_v50 = vadd.f32 %v2690_v29, %v2689_v42 }
 0x44b   :  { %v2692_v11 = vrot.slane %v2691_v50, 2 }
 0x4fa   :  { %v1708_v31 = vpop.f32.mrf.mxu0 }
 0x4fb   :  { %5492 = vmatmul.mubr.msk.f32.vlgmr.msra.gmra.mxu0 %vm1286_vm11, %v1708_v31 }
 0x4fc   :  { %v5473_v46 = vpop.f32.mrf.mxu0  ;;  %5500 = vmatpush3.msra.mxu0 %v123_v30  ;;  %5501 = vmatprep.mubr.msk.f32.mxu0 %vm5910_vm10, %v5909_v61  ;;  %v2696_v30 = vsel %vm151_vm1, %v2646_v36, 0.0 }
 0x4fd   :  { %5509 = vmatprep.subr.mxu0 %v5909_v61  ;;  %v2652_v46 = vrot.slane %v2651_v39, 1 }
 0x4fe   :  { %v1781_v47 = vpop.f32.mrf.mxu1 }
 0x4ff   :  { %5497 = vmatmul.mubr.msk.f32.vlgmr.msra.gmra.mxu1 %vm1286_vm11, %v1781_v47  ;;  %v2684_v47 = vadd.f32 %v2683_v41, %v2682_v24  ;;  %v6558_v52 = vadd.f32 %v2652_v46, %v2651_v39  ;;  %v2693_v24 = vadd.f32 %v2692_v11, %v2691_v50 }
 0x500   :  { %v5478_v33 = vpop.f32.mrf.mxu1  ;;  %5505 = vmatpush3.msra.mxu1 %v124_v32  ;;  %5506 = vmatprep.mubr.msk.f32.mxu1 %vm5910_vm10, %v5909_v61  ;;  %v2659_v32 = vrot.slane %v2658_v40, 1 }
 0x501   :  { %5520 = vmatprep.subr.mxu1 %v5909_v61  ;;  %v2685_v54 = vrot.slane %v2684_v47, 2 }
 0x502   :  { %v6560_v53 = vadd.f32 %v2659_v32, %v2658_v40 }
 0x503   :  { %v2686_v6 = vadd.f32 %v2685_v54, %v2684_v47 }
 0x504   :  { %v1927_v48 = vpop.f32.mrf.mxu1  ;;  %v2711_v13 = vsel %vm216_vm2, %v6560_v53, %v6558_v52 }
 0x505   :  { %v1854_v34 = vpop.f32.mrf.mxu0  ;;  %5507 = vmatmul.mubr.msk.f32.vlgmr.msra.gmra.mxu1 %vm1286_vm11, %v1927_v48  ;;  %v2672_v48 = vadd.f32 %v2671_v44, %v2670_v25  ;;  %v2687_v23 = vrot.slane %v2686_v6, 1  ;;  %v2694_v44 = vrot.slane %v2693_v24, 1 }
 0x506   :  { %5502 = vmatmul.mubr.msk.f32.vlgmr.msra.gmra.mxu0 %vm1286_vm11, %v1854_v34  ;;  %v5488_v49 = vpop.f32.mrf.mxu1  ;;  %5536 = vmatprep.mubr.msk.f32.mxu1 %vm5910_vm10, %v5909_v61  ;;  %v2678_v34 = vrot.slane %v2677_v28, 2 }
 0x507   :  { %v5483_v35 = vpop.f32.mrf.mxu0  ;;  %5517 = vmatprep.mubr.msk.f32.mxu0 %vm5910_vm10, %v5909_v61  ;;  %v2697_v49 = vrot.slane %v2696_v30, 4  ;;  %v2673_v57 = vrot.slane %v2672_v48, 1 }
 0x508   :  { %v2666_v35 = vrot.slane %v2665_v45, 1  ;;  %v2679_v58 = vadd.f32 %v2678_v34, %v2677_v28 }
 0x509   :  { %v2698_v59 = vadd.f32 %v2697_v49, %v2696_v30  ;;  %v6573_v18 = vadd.f32 %v2673_v57, %v2672_v48 }
 0x50a   :  { %v6563_v3 = vadd.f32 %v2666_v35, %v2665_v45  ;;  %v2680_v19 = vrot.slane %v2679_v58, 1  ;;  %v6592_v35 = vadd.f32 %v2694_v44, %v2693_v24 }
 0x50b   :  { %v2699_v20 = vrot.slane %v2698_v59, 2 }
 0x50c   :  { %v2712_v22 = vsel %vm218_vm3, %v6563_v3, %v2711_v13  ;;  %v6577_v26 = vadd.f32 %v2680_v19, %v2679_v58 }
 0x50d   :  { %v2700_v27 = vadd.f32 %v2699_v20, %v2698_v59  ;;  %v2713_v36 = vsel %vm220_vm4, %v6573_v18, %v2712_v22 }
 0x50e   :  { %v2714_v32 = vsel %vm222_vm5, %v6577_v26, %v2713_v36 }
 0x50f   :  { %v2701_v46 = vrot.slane %v2700_v27, 1 }
 0x511   :  { %v6600_v54 = vadd.f32 %v2701_v46, %v2700_v27 }
 0x5bb   :  { %v2000_v38 = vpop.f32.mrf.mxu0 }
 0x5bc   :  { %v2223_v55 = vsel %vm231_vm9, %v2000_v38, 0.0 }
 0x5bd   :  { %v5493_v43 = vpop.f32.mrf.mxu0 }
 0x5be   :  { %v6581_v43 = vadd.f32 %v2687_v23, %v2686_v6 }
 0x5bf   :  { %v2073_v31 = vpop.f32.mrf.mxu1 }
 0x5c0   :  { %v2224_v51 = vsel %vm231_vm9, %v2073_v31, 0.0 }
 0x5c1   :  { %v5498_v33 = vpop.f32.mrf.mxu1  ;;  %v2225_v60 = vadd.f32 %v2224_v51, %v2223_v55 }
 0x5c5   :  { %v2219_v56 = vpop.f32.mrf.mxu1 }
 0x5c6   :  { %v2146_v2 = vpop.f32.mrf.mxu0  ;;  %v2228_v17 = vsel %vm231_vm9, %v2219_v56, 0.0 }
 0x5c7   :  { %v2226_v4 = vsel %vm231_vm9, %v2146_v2, 0.0  ;;  %v5508_v5 = vpop.f32.mrf.mxu1 }
 0x5c8   :  { %v2227_v14 = vadd.f32 %v2226_v4, %v2225_v60  ;;  %v5503_v15 = vpop.f32.mrf.mxu0 }
 0x5ca   :  { %v2229_v21 = vadd.f32 %v2228_v17, %v2227_v14 }
 0x5cc   :  { %v2236_v25 = vadd.f32 %v5086_v16, %v2229_v21 }
 0x5ce   :  { %v2238_v37 = vrot.slane %v2236_v25, 1  ;;  %v2239_v38 = vrot.slane %v2236_v25, 2  ;;  %v2240_v39 = vrot.slane %v2236_v25, 3  ;;  %v2241_v40 = vrot.slane %v2236_v25, 4 }
 0x5cf   :  { %v2242_v41 = vrot.slane %v2236_v25, 5  ;;  %v2243_v42 = vrot.slane %v2236_v25, 6  ;;  %v2244_v28 = vrot.slane %v2236_v25, 7  ;;  %v2253_v47 = vadd.f32 %v2236_v25, %v6045_v62 }
 0x5d0   :  { %v2254_v45 = vadd.f32 %v2238_v37, %v6047_v63  ;;  %v2255_v29 = vadd.f32 %v2239_v38, %v6049_v0  ;;  %v2256_v30 = vadd.f32 %v2240_v39, %v6051_v1  ;;  %v2257_v31 = vadd.f32 %v2241_v40, %v6056_v8 }
 0x5d1   :  { %v2258_v33 = vadd.f32 %v2242_v41, %v6058_v9  ;;  %v2259_v49 = vadd.f32 %v2243_v42, %v6060_v10  ;;  %v2260_v63 = vadd.f32 %v2244_v28, %v6064_v12  ;;  %v2715_v8 = vsel %vm224_vm6, %v6581_v43, %v2714_v32 }
 0x5d2   :  { %v2269_v48 = vrot.slane %v2254_v45, 7  ;;  %v2271_v34 = vrot.slane %v2255_v29, 6  ;;  %v2273_v1 = vrot.slane %v2256_v30, 5  ;;  %v2275_v51 = vrot.slane %v2257_v31, 4 }
 0x5d3   :  { %v2277_v9 = vrot.slane %v2258_v33, 3  ;;  %v2279_v55 = vrot.slane %v2259_v49, 2  ;;  %v2716_v12 = vsel %vm226_vm7, %v6592_v35, %v2715_v8  ;;  %v2281_v57 = vrot.slane %v2260_v63, 1 }
 0x5d4   :  { %v2270_v0 = vsel %vm216_vm2, %v2269_v48, %v2253_v47  ;;  %v2717_v60 = vsel %vm228_vm8, %v6600_v54, %v2716_v12 }
 0x5d5   :  { %v2272_v50 = vsel %vm218_vm3, %v2271_v34, %v2270_v0  ;;  %v2719_v4 = vsel %vm231_vm9, %v2717_v60, 0.0 }
 0x5d6   :  { %v2274_v62 = vsel %vm220_vm4, %v2273_v1, %v2272_v50 }
 0x5d7   :  { %v2276_v10 = vsel %vm222_vm5, %v2275_v51, %v2274_v62 }
 0x5d8   :  { %v2278_v56 = vsel %vm224_vm6, %v2277_v9, %v2276_v10 }
 0x5d9   :  { %v2280_v58 = vsel %vm226_vm7, %v2279_v55, %v2278_v56 }
 0x5da   :  { %v2282_v59 = vsel %vm228_vm8, %v2281_v57, %v2280_v58 }
 0x5db   :  { %v2284_v2 = vsel %vm231_vm9, %v2282_v59, 0.0 }
 0x5dc   :  { %2285 = vadd.xlane.f32.xlu0 %v2284_v2 }
 0x5e0   :  { %2720 = vadd.xlane.f32.xlu0 %v2719_v4 }
 0x665   :  { %v2286_v5 = vpop.xlane.xlu0 %2285 }
 0x666   :  { %v2287_v6 = vmul.f32 0.03125, %v2286_v5 }
 0x668   :  { %v2289_v11 = vrot.slane %v2287_v6, 1  ;;  %v2290_v13 = vrot.slane %v2287_v6, 2  ;;  %v2291_v14 = vrot.slane %v2287_v6, 3  ;;  %v2292_v15 = vrot.slane %v2287_v6, 4 }
 0x669   :  { %v2721_v16 = vpop.xlane.xlu0 %2720  ;;  %v2293_v17 = vrot.slane %v2287_v6, 5  ;;  %v2294_v19 = vrot.slane %v2287_v6, 6  ;;  %v2295_v20 = vrot.slane %v2287_v6, 7  ;;  %v6612_v21 = vsub.f32 %v2253_v47, %v2287_v6 }
 0x66a   :  { %v2722_v22 = vmul.f32 0.03125, %v2721_v16  ;;  %v6614_v23 = vsub.f32 %v2254_v45, %v2289_v11  ;;  %v6616_v24 = vsub.f32 %v2255_v29, %v2290_v13  ;;  %v6618_v25 = vsub.f32 %v2256_v30, %v2291_v14 }
 0x66b   :  { %v6620_v27 = vsub.f32 %v2257_v31, %v2292_v15  ;;  %v6622_v36 = vsub.f32 %v2258_v33, %v2293_v17  ;;  %v6624_v37 = vsub.f32 %v2259_v49, %v2294_v19  ;;  %v6626_v38 = vsub.f32 %v2260_v63, %v2295_v20 }
 0x66c   :  { %v2312_v39 = vmul.f32 %v6612_v21, %v6612_v21  ;;  %v2313_v40 = vmul.f32 %v6614_v23, %v6614_v23  ;;  %v2314_v41 = vmul.f32 %v6616_v24, %v6616_v24  ;;  %v2315_v42 = vmul.f32 %v6618_v25, %v6618_v25 }
 0x66d   :  { %v2316_v44 = vmul.f32 %v6620_v27, %v6620_v27  ;;  %v2317_v28 = vmul.f32 %v6622_v36, %v6622_v36  ;;  %v2318_v45 = vmul.f32 %v6624_v37, %v6624_v37  ;;  %v2319_v29 = vmul.f32 %v6626_v38, %v6626_v38 }
 0x66e   :  { %v2328_v30 = vrot.slane %v2313_v40, 7  ;;  %v2330_v31 = vrot.slane %v2314_v41, 6  ;;  %v2332_v46 = vrot.slane %v2315_v42, 5  ;;  %v2724_v32 = vrot.slane %v2722_v22, 1 }
 0x66f   :  { %v2334_v47 = vrot.slane %v2316_v44, 4  ;;  %v2336_v33 = vrot.slane %v2317_v28, 3  ;;  %v2338_v48 = vrot.slane %v2318_v45, 2  ;;  %v2340_v34 = vrot.slane %v2319_v29, 1 }
 0x670   :  { %v2329_v49 = vsel %vm216_vm2, %v2328_v30, %v2312_v39  ;;  %v2725_v63 = vrot.slane %v2722_v22, 2  ;;  %v2726_v0 = vrot.slane %v2722_v22, 3  ;;  %v2727_v1 = vrot.slane %v2722_v22, 4 }
 0x671   :  { %v2331_v8 = vsel %vm218_vm3, %v2330_v31, %v2329_v49  ;;  %v2728_v50 = vrot.slane %v2722_v22, 5  ;;  %v2729_v51 = vrot.slane %v2722_v22, 6  ;;  %v2730_v62 = vrot.slane %v2722_v22, 7  ;;  %v6708_v49 = vld [vmem:[%s7415_s11 + $0x10] sm:$0xff] }
 0x672   :  { %v2333_v9 = vsel %vm220_vm4, %v2332_v46, %v2331_v8  ;;  %v6648_v10 = vsub.f32 %v6558_v52, %v2722_v22  ;;  %v6651_v55 = vsub.f32 %v6560_v53, %v2724_v32  ;;  %v6654_v12 = vsub.f32 %v6563_v3, %v2725_v63  ;;  %v6715_v63 = vld [vmem:[%s7415_s11 + $0x8] sm:$0xff] }
 0x673   :  { %v2335_v56 = vsel %vm222_vm5, %v2334_v47, %v2333_v9  ;;  %v6658_v57 = vsub.f32 %v6573_v18, %v2726_v0  ;;  %v6661_v58 = vsub.f32 %v6577_v26, %v2727_v1  ;;  %v6664_v59 = vsub.f32 %v6581_v43, %v2728_v50  ;;  %v6722_v0 = vld [vmem:[%s7415_s11] sm:$0xff] }
 0x674   :  { %v2337_v60 = vsel %vm224_vm6, %v2336_v33, %v2335_v56  ;;  %v6668_v2 = vsub.f32 %v6592_v35, %v2729_v51  ;;  %v6671_v4 = vsub.f32 %v6600_v54, %v2730_v62  ;;  %v2747_v5 = vmul.f32 %v6648_v10, %v6648_v10 }
 0x675   :  { %v2339_v6 = vsel %vm226_vm7, %v2338_v48, %v2337_v60  ;;  %v2748_v11 = vmul.f32 %v6651_v55, %v6651_v55  ;;  %v2749_v13 = vmul.f32 %v6654_v12, %v6654_v12  ;;  %v2750_v14 = vmul.f32 %v6658_v57, %v6658_v57 }
 0x676   :  { %v2341_v15 = vsel %vm228_vm8, %v2340_v34, %v2339_v6  ;;  %v2751_v16 = vmul.f32 %v6661_v58, %v6661_v58  ;;  %v2752_v17 = vmul.f32 %v6664_v59, %v6664_v59  ;;  %v2753_v19 = vmul.f32 %v6668_v2, %v6668_v2  ;;  %v6703_v34 = vld [vmem:[%s7415_s11 + $0x18] sm:$0xff] }
 0x677   :  { %v2343_v20 = vsel %vm231_vm9, %v2341_v15, 0.0  ;;  %v2754_v22 = vmul.f32 %v6671_v4, %v6671_v4  ;;  %v2763_v39 = vrot.slane %v2748_v11, 7  ;;  %v2765_v40 = vrot.slane %v2749_v13, 6  ;;  %5510 = vmatpush3.msra.mxu0 %v6703_v34 }
 0x678   :  { %2344 = vadd.xlane.f32.xlu1 %v2343_v20  ;;  %v2767_v41 = vrot.slane %v2750_v14, 5  ;;  %v2769_v42 = vrot.slane %v2751_v16, 4  ;;  %v2771_v28 = vrot.slane %v2752_v17, 3  ;;  %v2773_v29 = vrot.slane %v2753_v19, 2  ;;  %5511 = vmatprep.subr.mxu0 %v5909_v61 }
 0x679   :  { %v2764_v44 = vsel %vm216_vm2, %v2763_v39, %v2747_v5  ;;  %v2775_v31 = vrot.slane %v2754_v22, 1  ;;  %5512 = vmatpush3.msra.mxu0 %v6708_v49 }
 0x67a   :  { %v2766_v45 = vsel %vm218_vm3, %v2765_v40, %v2764_v44  ;;  %5513 = vmatprep.subr.mxu0 %v5909_v61 }
 0x67b   :  { %v2768_v30 = vsel %vm220_vm4, %v2767_v41, %v2766_v45  ;;  %5514 = vmatpush3.msra.mxu0 %v6715_v63 }
 0x67c   :  { %v2770_v46 = vsel %vm222_vm5, %v2769_v42, %v2768_v30  ;;  %5515 = vmatprep.subr.mxu0 %v5909_v61  ;;  %v5818_v42 = vld [vmem:[%s7405_s1] ss:$0 sm:$0xff] }
 0x67d   :  { %v2772_v32 = vsel %vm224_vm6, %v2771_v28, %v2770_v46  ;;  %5516 = vmatpush3.msra.mxu0 %v6722_v0 }
 0x67e   :  { %v2774_v47 = vsel %vm226_vm7, %v2773_v29, %v2772_v32  ;;  %5539 = vmatprep.subr.mxu0 %v5909_v61 }
 0x67f   :  { %v2776_v33 = vsel %vm228_vm8, %v2775_v31, %v2774_v47 }
 0x680   :  { %v2778_v48 = vsel %vm231_vm9, %v2776_v33, 0.0 }
 0x681   :  { %2779 = vadd.xlane.f32.xlu1 %v2778_v48 }
 0x701   :  { %v2345_v1 = vpop.xlane.xlu1 %2344 }
 0x702   :  { %v2346_v8 = vmul.f32 0.03125, %v2345_v1 }
 0x704   :  { %v2347_v50 = vadd.f32 1e-05, %v2346_v8 }
 0x706   :  { %5784 = vrsqrt.f32 %v2347_v50 }
 0x70a   :  { %v2780_v51 = vpop.xlane.xlu1 %2779 }
 0x70b   :  { %v2781_v62 = vmul.f32 0.03125, %v2780_v51 }
 0x70d   :  { %v2782_v9 = vadd.f32 1e-05, %v2781_v62 }
 0x70f   :  { %5786 = vrsqrt.f32 %v2782_v9 }
 0x713   :  { %v5785_v56 = vpop.eup %5784 }
 0x714   :  { %v2350_v60 = vrot.slane %v5785_v56, 1  ;;  %v2351_v5 = vrot.slane %v5785_v56, 2  ;;  %v2352_v6 = vrot.slane %v5785_v56, 3  ;;  %v2353_v11 = vrot.slane %v5785_v56, 4 }
 0x715   :  { %v2354_v13 = vrot.slane %v5785_v56, 5  ;;  %v2355_v14 = vrot.slane %v5785_v56, 6  ;;  %v2356_v15 = vrot.slane %v5785_v56, 7  ;;  %v2365_v16 = vmul.f32 %v5785_v56, %v6612_v21 }
 0x716   :  { %v2366_v17 = vmul.f32 %v2350_v60, %v6614_v23  ;;  %v2367_v19 = vmul.f32 %v2351_v5, %v6616_v24  ;;  %v2368_v20 = vmul.f32 %v2352_v6, %v6618_v25  ;;  %v2369_v22 = vmul.f32 %v2353_v11, %v6620_v27  ;;  %v5819_v27 = vld [vmem:[%s7406_s2] ss:$0 sm:$0xff] }
 0x717   :  { %v2370_v39 = vmul.f32 %v2354_v13, %v6622_v36  ;;  %v2371_v40 = vmul.f32 %v2355_v14, %v6624_v37  ;;  %v2372_v41 = vmul.f32 %v2356_v15, %v6626_v38  ;;  %v2373_v44 = vmul.f32 %v5818_v42, %v2365_v16 }
 0x718   :  { %v2374_v21 = vmul.f32 %v5818_v42, %v2366_v17  ;;  %v2375_v28 = vmul.f32 %v5818_v42, %v2367_v19  ;;  %v2376_v23 = vmul.f32 %v5818_v42, %v2368_v20  ;;  %v2377_v45 = vmul.f32 %v5818_v42, %v2369_v22 }
 0x719   :  { %v2378_v24 = vmul.f32 %v5818_v42, %v2370_v39  ;;  %v2379_v29 = vmul.f32 %v5818_v42, %v2371_v40  ;;  %v2380_v25 = vmul.f32 %v5818_v42, %v2372_v41  ;;  %v6750_v31 = vadd.f32 %v5819_v27, %v2373_v44 }
 0x71a   :  { %v6742_v36 = vadd.f32 %v5819_v27, %v2374_v21  ;;  %v6744_v37 = vadd.f32 %v5819_v27, %v2375_v28  ;;  %v6746_v38 = vadd.f32 %v5819_v27, %v2376_v23  ;;  %v6748_v30 = vadd.f32 %v5819_v27, %v2377_v45 }
 0x71b   :  { %v6752_v46 = vadd.f32 %v5819_v27, %v2378_v24  ;;  %v6754_v32 = vadd.f32 %v5819_v27, %v2379_v29  ;;  %v6756_v47 = vadd.f32 %v5819_v27, %v2380_v25 }
 0x71c   :  { %v5787_v33 = vpop.eup %5786  ;;  %v2403_v48 = vrot.slane %v6742_v36, 7  ;;  %v2405_v1 = vrot.slane %v6744_v37, 6  ;;  %v2407_v8 = vrot.slane %v6746_v38, 5  ;;  %v2409_v50 = vrot.slane %v6748_v30, 4 }
 0x71d   :  { %v2411_v51 = vrot.slane %v6752_v46, 3  ;;  %v2413_v62 = vrot.slane %v6754_v32, 2  ;;  %v2415_v9 = vrot.slane %v6756_v47, 1  ;;  %v2785_v56 = vrot.slane %v5787_v33, 1 }
 0x71e   :  { %v2404_v60 = vsel %vm216_vm2, %v2403_v48, %v6750_v31  ;;  %v2786_v5 = vrot.slane %v5787_v33, 2  ;;  %v2787_v6 = vrot.slane %v5787_v33, 3  ;;  %v2788_v11 = vrot.slane %v5787_v33, 4 }
 0x71f   :  { %v2406_v13 = vsel %vm218_vm3, %v2405_v1, %v2404_v60  ;;  %v2789_v14 = vrot.slane %v5787_v33, 5  ;;  %v2790_v15 = vrot.slane %v5787_v33, 6  ;;  %v2791_v16 = vrot.slane %v5787_v33, 7 }
 0x720   :  { %v2408_v17 = vsel %vm220_vm4, %v2407_v8, %v2406_v13  ;;  %v2800_v19 = vmul.f32 %v5787_v33, %v6648_v10  ;;  %v2801_v20 = vmul.f32 %v2785_v56, %v6651_v55  ;;  %v2802_v22 = vmul.f32 %v2786_v5, %v6654_v12  ;;  %v5821_v56 = vld [vmem:[%s7407_s3 + $0x10] sm:$0xff]  ;;  %v5822_v13 = vld [vmem:[%s7407_s3 + $0x8] sm:$0xff] }
 0x721   :  { %v2410_v39 = vsel %vm222_vm5, %v2409_v50, %v2408_v17  ;;  %v2803_v40 = vmul.f32 %v2787_v6, %v6658_v57  ;;  %v2804_v41 = vmul.f32 %v2788_v11, %v6661_v58  ;;  %v2805_v44 = vmul.f32 %v2789_v14, %v6664_v59  ;;  %v5823_v17 = vld [vmem:[%s7407_s3] sm:$0xff] }
 0x722   :  { %v2412_v21 = vsel %vm224_vm6, %v2411_v51, %v2410_v39  ;;  %v2806_v28 = vmul.f32 %v2790_v15, %v6668_v2  ;;  %v2807_v23 = vmul.f32 %v2791_v16, %v6671_v4  ;;  %v2808_v45 = vmul.f32 %v5818_v42, %v2800_v19  ;;  %v5820_v2 = vld [vmem:[%s7407_s3 + $0x18] sm:$0xff] }
 0x723   :  { %v2414_v10 = vsel %vm226_vm7, %v2413_v62, %v2412_v21  ;;  %v2809_v55 = vmul.f32 %v5818_v42, %v2801_v20  ;;  %v2810_v24 = vmul.f32 %v5818_v42, %v2802_v22  ;;  %v2811_v12 = vmul.f32 %v5818_v42, %v2803_v40  ;;  %v5824_v40 = vld [vmem:[%s7407_s3 + $0x38] sm:$0xff]  ;;  %v5827_v21 = vld [vmem:[%s7407_s3 + $0x20] sm:$0xff] }
 0x724   :  { %v2416_v29 = vsel %vm228_vm8, %v2415_v9, %v2414_v10  ;;  %v2812_v25 = vmul.f32 %v5818_v42, %v2804_v41  ;;  %v2813_v57 = vmul.f32 %v5818_v42, %v2805_v44  ;;  %v2814_v33 = vmul.f32 %v5818_v42, %v2806_v28  ;;  %v5825_v41 = vld [vmem:[%s7407_s3 + $0x30] sm:$0xff]  ;;  %v5826_v44 = vld [vmem:[%s7407_s3 + $0x28] sm:$0xff]  ;;  %v5828_v28 = vld [vmem:[%s7407_s3 + $0x78] sm:$0xff] }
 0x725   :  { %5518 = vmatmul.mubr.msk.f32.vlgmr.msra.gmra.mxu0 %vm231_vm9, %v2416_v29  ;;  %v2815_v58 = vmul.f32 %v5818_v42, %v2807_v23  ;;  %v2816_v59 = vadd.f32 %v5819_v27, %v2808_v45  ;;  %v2817_v48 = vadd.f32 %v5819_v27, %v2809_v55  ;;  %v2818_v1 = vadd.f32 %v5819_v27, %v2810_v24  ;;  %v5829_v23 = vld [vmem:[%s7407_s3 + $0x70] sm:$0xff]  ;;  %v5830_v45 = vld [vmem:[%s7407_s3 + $0x68] sm:$0xff]  ;;  %v5831_v10 = vld [vmem:[%s7407_s3 + $0x60] sm:$0xff] }
 0x726   :  { %5540 = vmatpush3.msra.mxu0 %v5820_v2  ;;  %5547 = vmatprep.mubr.msk.f32.mxu0 %vm5910_vm10, %v5909_v61  ;;  %v2819_v4 = vadd.f32 %v5819_v27, %v2811_v12  ;;  %v2820_v8 = vadd.f32 %v5819_v27, %v2812_v25  ;;  %v2821_v50 = vadd.f32 %v5819_v27, %v2813_v57  ;;  %v5832_v55 = vld [vmem:[%s7408_s4 + $0x38] sm:$0xff]  ;;  %v5833_v24 = vld [vmem:[%s7408_s4 + $0x30] sm:$0xff]  ;;  %v5834_v12 = vld [vmem:[%s7408_s4 + $0x28] sm:$0xff] }
 0x727   :  { %5541 = vmatprep.subr.mxu0 %v5909_v61  ;;  %v2822_v51 = vadd.f32 %v5819_v27, %v2814_v33  ;;  %v2823_v62 = vadd.f32 %v5819_v27, %v2815_v58  ;;  %v2832_v9 = vrot.slane %v2817_v48, 7  ;;  %v2834_v42 = vrot.slane %v2818_v1, 6  ;;  %v5835_v29 = vld [vmem:[%s7408_s4 + $0x20] sm:$0xff]  ;;  %v5836_v25 = vld [vmem:[%s7408_s4 + $0x78] sm:$0xff]  ;;  %v5837_v57 = vld [vmem:[%s7408_s4 + $0x70] sm:$0xff] }
 0x728   :  { %5542 = vmatpush3.msra.mxu0 %v5821_v56  ;;  %v2836_v60 = vrot.slane %v2819_v4, 5  ;;  %v2838_v5 = vrot.slane %v2820_v8, 4  ;;  %v2840_v11 = vrot.slane %v2821_v50, 3  ;;  %v5838_v33 = vld [vmem:[%s7408_s4 + $0x68] sm:$0xff]  ;;  %v5839_v58 = vld [vmem:[%s7408_s4 + $0x60] sm:$0xff]  ;;  %v5841_v48 = vld [vmem:[%s7409_s5 + $0x30] sm:$0xff] }
 0x729   :  { %5543 = vmatprep.subr.mxu0 %v5909_v61  ;;  %v2833_v6 = vsel %vm216_vm2, %v2832_v9, %v2816_v59  ;;  %v2842_v14 = vrot.slane %v2822_v51, 2  ;;  %v2844_v16 = vrot.slane %v2823_v62, 1  ;;  %v5840_v59 = vld [vmem:[%s7409_s5 + $0x38] sm:$0xff]  ;;  %v5842_v1 = vld [vmem:[%s7409_s5 + $0x28] sm:$0xff]  ;;  %v5843_v2 = vld [vmem:[%s7409_s5 + $0x20] sm:$0xff] }
 0x72a   :  { %5544 = vmatpush3.msra.mxu0 %v5822_v13  ;;  %v2835_v27 = vsel %vm218_vm3, %v2834_v42, %v2833_v6  ;;  %v5844_v4 = vld [vmem:[%s7409_s5 + $0x78] sm:$0xff]  ;;  %v5845_v8 = vld [vmem:[%s7409_s5 + $0x70] sm:$0xff]  ;;  %v5846_v50 = vld [vmem:[%s7409_s5 + $0x68] sm:$0xff] }
 0x72b   :  { %5545 = vmatprep.subr.mxu0 %v5909_v61  ;;  %v2837_v15 = vsel %vm220_vm4, %v2836_v60, %v2835_v27  ;;  %v5847_v51 = vld [vmem:[%s7409_s5 + $0x60] sm:$0xff]  ;;  %v6936_v62 = vld [vmem:[%s7417_s13 + $0x38] sm:$0xff]  ;;  %v6943_v9 = vld [vmem:[%s7417_s13 + $0x30] sm:$0xff] }
 0x72c   :  { %5546 = vmatpush3.msra.mxu0 %v5823_v17  ;;  %v2839_v19 = vsel %vm222_vm5, %v2838_v5, %v2837_v15  ;;  %5521 = vmatpush3.msra.mxu1 %v6936_v62  ;;  %v6950_v42 = vld [vmem:[%s7417_s13 + $0x28] sm:$0xff]  ;;  %v6957_v56 = vld [vmem:[%s7417_s13 + $0x20] sm:$0xff]  ;;  %v6964_v60 = vld [vmem:[%s7417_s13 + $0x18] sm:$0xff] }
 0x72d   :  { %5550 = vmatprep.subr.mxu0 %v5909_v61  ;;  %v2841_v20 = vsel %vm224_vm6, %v2840_v11, %v2839_v19  ;;  %5522 = vmatprep.subr.mxu1 %v5909_v61  ;;  %v6971_v5 = vld [vmem:[%s7417_s13 + $0x10] sm:$0xff]  ;;  %v6977_v6 = vld [vmem:[%s7417_s13 + $0x8] sm:$0xff]  ;;  %v6983_v11 = vld [vmem:[%s7417_s13] sm:$0xff] }
 0x72e   :  { %v2843_v22 = vsel %vm226_vm7, %v2842_v14, %v2841_v20  ;;  %5523 = vmatpush3.msra.mxu1 %v6943_v9  ;;  %v6992_v13 = vld [vmem:[%s7416_s12] ss:$0 sm:$0xff] }
 0x72f   :  { %v6807_v39 = vsel %vm228_vm8, %v2844_v16, %v2843_v22  ;;  %5524 = vmatprep.subr.mxu1 %v5909_v61 }
 0x730   :  { %5548 = vmatmul.mubr.msk.f32.vlgmr.msra.gmra.mxu0 %vm231_vm9, %v6807_v39  ;;  %5525 = vmatpush3.msra.mxu1 %v6950_v42 }
 0x731   :  { %5551 = vmatpush3.msra.mxu0 %v5824_v40  ;;  %5558 = vmatprep.mubr.msk.f32.mxu0 %vm5910_vm10, %v5909_v61 }
 0x732   :  { %5552 = vmatprep.subr.mxu0 %v5909_v61  ;;  %5526 = vmatprep.subr.mxu1 %v5909_v61 }
 0x733   :  { %5553 = vmatpush3.msra.mxu0 %v5825_v41  ;;  %5527 = vmatpush3.msra.mxu1 %v6957_v56 }
 0x734   :  { %5554 = vmatprep.subr.mxu0 %v5909_v61  ;;  %5528 = vmatprep.subr.mxu1 %v5909_v61 }
 0x735   :  { %5555 = vmatpush3.msra.mxu0 %v5826_v44  ;;  %5529 = vmatpush3.msra.mxu1 %v6964_v60 }
 0x736   :  { %5556 = vmatprep.subr.mxu0 %v5909_v61  ;;  %5530 = vmatprep.subr.mxu1 %v5909_v61 }
 0x737   :  { %5557 = vmatpush3.msra.mxu0 %v5827_v21  ;;  %5531 = vmatpush3.msra.mxu1 %v6971_v5 }
 0x738   :  { %5572 = vmatprep.subr.mxu0 %v5909_v61  ;;  %5559 = vmatmul.mubr.msk.f32.vlgmr.msra.gmra.mxu0 %vm231_vm9, %v6807_v39 }
 0x739   :  { %5573 = vmatpush3.msra.mxu0 %v5828_v28  ;;  %5580 = vmatprep.mubr.msk.f32.mxu0 %vm5910_vm10, %v5909_v61  ;;  %v5848_v28 = vld [vmem:[%s7407_s3 + $0x58] sm:$0xff] }
 0x73a   :  { %5574 = vmatprep.subr.mxu0 %v5909_v61  ;;  %5532 = vmatprep.subr.mxu1 %v5909_v61 }
 0x73b   :  { %5575 = vmatpush3.msra.mxu0 %v5829_v23  ;;  %5533 = vmatpush3.msra.mxu1 %v6977_v6  ;;  %v5849_v23 = vld [vmem:[%s7407_s3 + $0x50] sm:$0xff] }
 0x73c   :  { %5576 = vmatprep.subr.mxu0 %v5909_v61  ;;  %5534 = vmatprep.subr.mxu1 %v5909_v61 }
 0x73d   :  { %5577 = vmatpush3.msra.mxu0 %v5830_v45  ;;  %5535 = vmatpush3.msra.mxu1 %v6983_v11 }
 0x73e   :  { %5578 = vmatprep.subr.mxu0 %v5909_v61  ;;  %5561 = vmatprep.subr.mxu1 %v5909_v61 }
 0x73f   :  { %5579 = vmatpush3.msra.mxu0 %v5831_v10  ;;  %v5850_v10 = vld [vmem:[%s7407_s3 + $0x48] sm:$0xff] }
 0x740   :  { %5594 = vmatprep.subr.mxu0 %v5909_v61  ;;  %5581 = vmatmul.mubr.msk.f32.vlgmr.msra.gmra.mxu0 %vm231_vm9, %v6807_v39 }
 0x741   :  { %5595 = vmatpush3.msra.mxu0 %v5832_v55  ;;  %5602 = vmatprep.mubr.msk.f32.mxu0 %vm5910_vm10, %v5909_v61 }
 0x742   :  { %5596 = vmatprep.subr.mxu0 %v5909_v61 }
 0x743   :  { %5597 = vmatpush3.msra.mxu0 %v5833_v24  ;;  %v5851_v24 = vld [vmem:[%s7407_s3 + $0x40] sm:$0xff] }
 0x744   :  { %5598 = vmatprep.subr.mxu0 %v5909_v61 }
 0x745   :  { %5599 = vmatpush3.msra.mxu0 %v5834_v12  ;;  %v5852_v12 = vld [vmem:[%s7408_s4 + $0x18] sm:$0xff] }
 0x746   :  { %5600 = vmatprep.subr.mxu0 %v5909_v61 }
 0x747   :  { %5601 = vmatpush3.msra.mxu0 %v5835_v29  ;;  %v5853_v29 = vld [vmem:[%s7408_s4 + $0x10] sm:$0xff] }
 0x748   :  { %5603 = vmatmul.mubr.msk.f32.vlgmr.msra.gmra.mxu0 %vm231_vm9, %v6807_v39  ;;  %5616 = vmatprep.subr.mxu0 %v5909_v61 }
 0x749   :  { %5617 = vmatpush3.msra.mxu0 %v5836_v25  ;;  %5624 = vmatprep.mubr.msk.f32.mxu0 %vm5910_vm10, %v5909_v61 }
 0x74a   :  { %5618 = vmatprep.subr.mxu0 %v5909_v61 }
 0x74b   :  { %5619 = vmatpush3.msra.mxu0 %v5837_v57  ;;  %v5854_v57 = vld [vmem:[%s7408_s4 + $0x8] sm:$0xff] }
 0x74c   :  { %5620 = vmatprep.subr.mxu0 %v5909_v61 }
 0x74d   :  { %5621 = vmatpush3.msra.mxu0 %v5838_v33 }
 0x74e   :  { %5622 = vmatprep.subr.mxu0 %v5909_v61 }
 0x74f   :  { %5623 = vmatpush3.msra.mxu0 %v5839_v58  ;;  %v5855_v58 = vld [vmem:[%s7408_s4] sm:$0xff] }
 0x750   :  { %5625 = vmatmul.mubr.msk.f32.vlgmr.msra.gmra.mxu0 %vm231_vm9, %v6807_v39  ;;  %5638 = vmatprep.subr.mxu0 %v5909_v61 }
 0x751   :  { %5639 = vmatpush3.msra.mxu0 %v5840_v59  ;;  %5646 = vmatprep.mubr.msk.f32.mxu0 %vm5910_vm10, %v5909_v61  ;;  %v5856_v59 = vld [vmem:[%s7408_s4 + $0x58] sm:$0xff] }
 0x752   :  { %5640 = vmatprep.subr.mxu0 %v5909_v61 }
 0x753   :  { %5641 = vmatpush3.msra.mxu0 %v5841_v48  ;;  %v5857_v48 = vld [vmem:[%s7408_s4 + $0x50] sm:$0xff] }
 0x754   :  { %5642 = vmatprep.subr.mxu0 %v5909_v61 }
 0x755   :  { %5643 = vmatpush3.msra.mxu0 %v5842_v1 }
 0x756   :  { %5644 = vmatprep.subr.mxu0 %v5909_v61 }
 0x757   :  { %5645 = vmatpush3.msra.mxu0 %v5843_v2  ;;  %v5858_v2 = vld [vmem:[%s7408_s4 + $0x48] sm:$0xff] }
 0x758   :  { %5647 = vmatmul.mubr.msk.f32.vlgmr.msra.gmra.mxu0 %vm231_vm9, %v6807_v39  ;;  %5660 = vmatprep.subr.mxu0 %v5909_v61 }
 0x759   :  { %5661 = vmatpush3.msra.mxu0 %v5844_v4  ;;  %5668 = vmatprep.mubr.msk.f32.mxu0 %vm5910_vm10, %v5909_v61 }
 0x75a   :  { %5662 = vmatprep.subr.mxu0 %v5909_v61 }
 0x75b   :  { %5663 = vmatpush3.msra.mxu0 %v5845_v8  ;;  %v5859_v8 = vld [vmem:[%s7408_s4 + $0x40] sm:$0xff] }
 0x75c   :  { %5664 = vmatprep.subr.mxu0 %v5909_v61 }
 0x75d   :  { %5665 = vmatpush3.msra.mxu0 %v5846_v50  ;;  %v5860_v50 = vld [vmem:[%s7409_s5 + $0x18] sm:$0xff] }
 0x75e   :  { %5666 = vmatprep.subr.mxu0 %v5909_v61 }
 0x75f   :  { %5667 = vmatpush3.msra.mxu0 %v5847_v51  ;;  %v5861_v51 = vld [vmem:[%s7409_s5 + $0x10] sm:$0xff] }
 0x760   :  { %5669 = vmatmul.mubr.msk.f32.vlgmr.msra.gmra.mxu0 %vm231_vm9, %v6807_v39  ;;  %5681 = vmatprep.subr.mxu0 %v5909_v61 }
 0x761   :  { %5683 = vmatprep.mubr.msk.f32.mxu0 %vm5910_vm10, %v5909_v61 }
 0x7e5   :  { %v2485_v27 = vpop.f32.mrf.mxu0 }
 0x7e6   :  { %v2486_v14 = vadd.f32 %v6992_v13, %v2485_v27 }
 0x7e7   :  { %v5519_v15 = vpop.f32.mrf.mxu0 }
 0x7e8   :  { %v2490_v16 = vmul.f32 0.70710677, %v2486_v14  ;;  %v2489_v22 = vmul.f32 0.5, %v2486_v14  ;;  %v5862_v14 = vld [vmem:[%s7409_s5 + $0x8] sm:$0xff] }
 0x7ea   :  { %5788 = verf.f32 %v2490_v16  ;;  %v5863_v16 = vld [vmem:[%s7409_s5] sm:$0xff] }
 0x7f0   :  { %v6995_v17 = vpop.f32.mrf.mxu0 }
 0x7f2   :  { %v5549_v19 = vpop.f32.mrf.mxu0 }
 0x7f3   :  { %v5864_v19 = vld [vmem:[%s7409_s5 + $0x58] sm:$0xff] }
 0x7f7   :  { %v5789_v20 = vpop.eup %5788 }
 0x7f8   :  { %v2492_v40 = vadd.f32 1.0, %v5789_v20  ;;  %v6997_v41 = vpop.f32.mrf.mxu0  ;;  %v5865_v20 = vld [vmem:[%s7409_s5 + $0x50] sm:$0xff] }
 0x7fa   :  { %v2493_v44 = vmul.f32 %v2492_v40, %v2489_v22  ;;  %v5560_v21 = vpop.f32.mrf.mxu0  ;;  %v5866_v40 = vld [vmem:[%s7409_s5 + $0x48] sm:$0xff] }
 0x7fb   :  { %v5867_v21 = vld [vmem:[%s7409_s5 + $0x40] sm:$0xff] }
 0x7fc   :  { %5537 = vmatmul.mubr.msk.f32.vlgmr.msra.gmra.mxu1 %vm2500_vm13, %v2493_v44 }
 0x7fd   :  { %5562 = vmatpush3.msra.mxu1 %v5848_v28  ;;  %5569 = vmatprep.mubr.msk.f32.mxu1 %vm5910_vm10, %v5909_v61 }
 0x7fe   :  { %5563 = vmatprep.subr.mxu1 %v5909_v61 }
 0x7ff   :  { %5564 = vmatpush3.msra.mxu1 %v5849_v23 }
 0x800   :  { %5565 = vmatprep.subr.mxu1 %v5909_v61  ;;  %v7010_v45 = vpop.f32.mrf.mxu0 }
 0x801   :  { %5566 = vmatpush3.msra.mxu1 %v5850_v10 }
 0x802   :  { %5567 = vmatprep.subr.mxu1 %v5909_v61  ;;  %v5582_v55 = vpop.f32.mrf.mxu0 }
 0x803   :  { %5568 = vmatpush3.msra.mxu1 %v5851_v24 }
 0x804   :  { %5570 = vmatmul.mubr.msk.f32.vlgmr.msra.gmra.mxu1 %vm231_vm9, %v6807_v39  ;;  %5583 = vmatprep.subr.mxu1 %v5909_v61 }
 0x805   :  { %5584 = vmatpush3.msra.mxu1 %v5852_v12  ;;  %5591 = vmatprep.mubr.msk.f32.mxu1 %vm5910_vm10, %v5909_v61  ;;  %v5868_v12 = vld [vmem:[%s7411_s7] ss:$0 sm:$0xff] }
 0x806   :  { %5585 = vmatprep.subr.mxu1 %v5909_v61 }
 0x807   :  { %5586 = vmatpush3.msra.mxu1 %v5853_v29 }
 0x808   :  { %v7031_v25 = vpop.f32.mrf.mxu0  ;;  %5587 = vmatprep.subr.mxu1 %v5909_v61 }
 0x809   :  { %5588 = vmatpush3.msra.mxu1 %v5854_v57 }
 0x80a   :  { %v5604_v33 = vpop.f32.mrf.mxu0  ;;  %5589 = vmatprep.subr.mxu1 %v5909_v61 }
 0x80b   :  { %5590 = vmatpush3.msra.mxu1 %v5855_v58  ;;  %v5870_v58 = vld [vmem:[%s7411_s7 + $0x1] ss:$0 sm:$0xff] }
 0x80c   :  { %5592 = vmatmul.mubr.msk.f32.vlgmr.msra.gmra.mxu1 %vm231_vm9, %v6807_v39  ;;  %5605 = vmatprep.subr.mxu1 %v5909_v61 }
 0x80d   :  { %5606 = vmatpush3.msra.mxu1 %v5856_v59  ;;  %5613 = vmatprep.mubr.msk.f32.mxu1 %vm5910_vm10, %v5909_v61  ;;  %v3265_v59 = vadd.f32 %v5870_v58, %v7031_v25  ;;  %v5872_v25 = vld [vmem:[%s7411_s7 + $0x3] ss:$0 sm:$0xff] }
 0x80e   :  { %5607 = vmatprep.subr.mxu1 %v5909_v61 }
 0x80f   :  { %5608 = vmatpush3.msra.mxu1 %v5857_v48  ;;  %v5871_v48 = vld [vmem:[%s7410_s6 + $0x1] ss:$0 sm:$0xff] }
 0x810   :  { %v7053_v1 = vpop.f32.mrf.mxu0  ;;  %5609 = vmatprep.subr.mxu1 %v5909_v61 }
 0x811   :  { %5610 = vmatpush3.msra.mxu1 %v5858_v2 }
 0x812   :  { %v5626_v4 = vpop.f32.mrf.mxu0  ;;  %5611 = vmatprep.subr.mxu1 %v5909_v61 }
 0x813   :  { %5612 = vmatpush3.msra.mxu1 %v5859_v8  ;;  %v3405_v4 = vadd.f32 %v5872_v25, %v7053_v1  ;;  %v5873_v8 = vld [vmem:[%s7411_s7 + $0x2] ss:$0 sm:$0xff] }
 0x814   :  { %5614 = vmatmul.mubr.msk.f32.vlgmr.msra.gmra.mxu1 %vm231_vm9, %v6807_v39  ;;  %5627 = vmatprep.subr.mxu1 %v5909_v61  ;;  %v5875_v1 = vld [vmem:[%s7410_s6 + $0x2] ss:$0 sm:$0xff] }
 0x815   :  { %5628 = vmatpush3.msra.mxu1 %v5860_v50  ;;  %5635 = vmatprep.mubr.msk.f32.mxu1 %vm5910_vm10, %v5909_v61 }
 0x816   :  { %5629 = vmatprep.subr.mxu1 %v5909_v61 }
 0x817   :  { %5630 = vmatpush3.msra.mxu1 %v5861_v51 }
 0x818   :  { %v7075_v27 = vpop.f32.mrf.mxu0  ;;  %5631 = vmatprep.subr.mxu1 %v5909_v61 }
 0x819   :  { %5632 = vmatpush3.msra.mxu1 %v5862_v14 }
 0x81a   :  { %v5648_v15 = vpop.f32.mrf.mxu0  ;;  %5633 = vmatprep.subr.mxu1 %v5909_v61 }
 0x81b   :  { %5634 = vmatpush3.msra.mxu1 %v5863_v16  ;;  %v5876_v16 = vld [vmem:[%s7412_s8 + $0x1] ss:$0 sm:$0xff] }
 0x81c   :  { %5636 = vmatmul.mubr.msk.f32.vlgmr.msra.gmra.mxu1 %vm231_vm9, %v6807_v39  ;;  %5649 = vmatprep.subr.mxu1 %v5909_v61 }
 0x81d   :  { %5650 = vmatpush3.msra.mxu1 %v5864_v19  ;;  %5657 = vmatprep.mubr.msk.f32.mxu1 %vm5910_vm10, %v5909_v61  ;;  %v3545_v19 = vadd.f32 %v5876_v16, %v7075_v27  ;;  %v5877_v27 = vld [vmem:[%s7412_s8] ss:$0 sm:$0xff] }
 0x81e   :  { %5651 = vmatprep.subr.mxu1 %v5909_v61 }
 0x81f   :  { %5652 = vmatpush3.msra.mxu1 %v5865_v20 }
 0x820   :  { %v7097_v22 = vpop.f32.mrf.mxu0  ;;  %5653 = vmatprep.subr.mxu1 %v5909_v61 }
 0x821   :  { %5654 = vmatpush3.msra.mxu1 %v5866_v40 }
 0x822   :  { %v5670_v44 = vpop.f32.mrf.mxu0  ;;  %5655 = vmatprep.subr.mxu1 %v5909_v61 }
 0x823   :  { %5656 = vmatpush3.msra.mxu1 %v5867_v21 }
 0x824   :  { %5658 = vmatmul.mubr.msk.f32.vlgmr.msra.gmra.mxu1 %vm231_vm9, %v6807_v39  ;;  %5671 = vmatprep.subr.mxu1 %v5909_v61  ;;  %v5869_v39 = vld [vmem:[%s7410_s6] ss:$0 sm:$0xff] }
 0x825   :  { %5673 = vmatprep.mubr.msk.f32.mxu1 %vm5910_vm10, %v5909_v61  ;;  %v2915_v33 = vadd.f32 %v5869_v39, %v6995_v17  ;;  %v2985_v17 = vadd.f32 %v5871_v48, %v6997_v41  ;;  %v5874_v41 = vld [vmem:[%s7410_s6 + $0x3] ss:$0 sm:$0xff] }
 0x826   :  { %v3125_v14 = vadd.f32 %v5874_v41, %v7010_v45 }
 0x8bc   :  { %v7112_v28 = vpop.f32.mrf.mxu1 }
 0x8be   :  { %v5538_v23 = vpop.f32.mrf.mxu1 }
 0x8c4   :  { %v3054_v10 = vpop.f32.mrf.mxu1 }
 0x8c5   :  { %v3055_v15 = vadd.f32 %v5875_v1, %v3054_v10 }
 0x8c6   :  { %v5571_v55 = vpop.f32.mrf.mxu1 }
 0x8cc   :  { %v3194_v24 = vpop.f32.mrf.mxu1 }
 0x8cd   :  { %v3195_v29 = vadd.f32 %v5868_v12, %v3194_v24 }
 0x8ce   :  { %v5593_v57 = vpop.f32.mrf.mxu1 }
 0x8cf   :  { %5672 = vmatpush3.xpose.msk.msra.mxu1 %vm1286_vm11, %v3195_v29 }
 0x8d0   :  { %5676 = vmatprep.subr.mxu1 %v5909_v61 }
 0x8d2   :  { %5674 = vmatmul.mubr.msk.f32.vlgmr.msra.gmra.mxu1 %vm1286_vm11, %v2915_v33 }
 0x8d3   :  { %5677 = vmatpush3.xpose.msk.msra.mxu1 %vm1286_vm11, %v3265_v59  ;;  %5678 = vmatprep.mubr.msk.f32.mxu1 %vm5910_vm10, %v5909_v61 }
 0x8d4   :  { %v3334_v2 = vpop.f32.mrf.mxu1  ;;  %5686 = vmatprep.subr.mxu1 %v5909_v61 }
 0x8d5   :  { %v3335_v50 = vadd.f32 %v5873_v8, %v3334_v2 }
 0x8d6   :  { %v5615_v51 = vpop.f32.mrf.mxu1  ;;  %5679 = vmatmul.mubr.msk.f32.vlgmr.msra.gmra.mxu1 %vm1286_vm11, %v2985_v17 }
 0x8d7   :  { %5682 = vmatpush3.xpose.msk.msra.mxu0 %vm1286_vm11, %v3335_v50  ;;  %5687 = vmatpush3.xpose.msk.msra.mxu1 %vm1286_vm11, %v3405_v4 }
 0x8d8   :  { %5688 = vmatprep.mubr.msk.f32.mxu1 %vm5910_vm10, %v5909_v61  ;;  %5696 = vmatprep.subr.mxu1 %v5909_v61 }
 0x8d9   :  { %5691 = vmatprep.subr.mxu0 %v5909_v61 }
 0x8da   :  { %5684 = vmatmul.mubr.msk.f32.vlgmr.msra.gmra.mxu0 %vm1286_vm11, %v3055_v15  ;;  %5689 = vmatmul.mubr.msk.f32.vlgmr.msra.gmra.mxu1 %vm1286_vm11, %v3125_v14 }
 0x8db   :  { %5697 = vmatpush3.msra.mxu1 %v3545_v19  ;;  %5693 = vmatprep.mubr.msk.f32.mxu0 %vm5910_vm10, %v5909_v61 }
 0x8dc   :  { %v3474_v45 = vpop.f32.mrf.mxu1  ;;  %5698 = vmatprep.mubr.msk.f32.mxu1 %vm5910_vm10, %v5909_v61  ;;  %5706 = vmatprep.subr.mxu1 %v5909_v61 }
 0x8dd   :  { %v3475_v20 = vadd.f32 %v5877_v27, %v3474_v45 }
 0x8de   :  { %v5637_v40 = vpop.f32.mrf.mxu1 }
 0x8df   :  { %5692 = vmatpush3.msra.mxu0 %v3475_v20 }
 0x8e0   :  { %5701 = vmatprep.subr.mxu0 %v5909_v61 }
 0x8e4   :  { %v3614_v44 = vpop.f32.mrf.mxu1 }
 0x8e6   :  { %v5659_v21 = vpop.f32.mrf.mxu1 }
 0x992   :  { %v3760_v23 = vpop.f32.mrf.mxu1 }
 0x993   :  { %v3992_v10 = vmul.f32 0.35355338, %v3760_v23 }
 0x994   :  { %v5675_v55 = vpop.f32.mrf.mxu1 }
 0x995   :  { %v3996_v24 = vsel %vm1286_vm11, %v3992_v10, -inf }
 0x996   :  { %3997 = vmax.xlane.f32.xlu0 %v3996_v24  ;;  %v3836_v12 = vpop.f32.mrf.mxu1 }
 0x997   :  { %v3993_v29 = vmul.f32 0.35355338, %v3836_v12 }
 0x998   :  { %v5680_v57 = vpop.f32.mrf.mxu1 }
 0x999   :  { %v3999_v39 = vsel %vm1286_vm11, %v3993_v29, -inf }
 0x99a   :  { %4000 = vmax.xlane.f32.xlu1 %v3999_v39  ;;  %v3912_v33 = vpop.f32.mrf.mxu0  ;;  %v3988_v58 = vpop.f32.mrf.mxu1 }
 0x99b   :  { %v3994_v59 = vmul.f32 0.35355338, %v3912_v33  ;;  %v3995_v48 = vmul.f32 0.35355338, %v3988_v58 }
 0x99c   :  { %v5685_v17 = vpop.f32.mrf.mxu0  ;;  %v5690_v2 = vpop.f32.mrf.mxu1 }
 0x99d   :  { %v4005_v25 = vsel %vm1286_vm11, %v3995_v48, -inf  ;;  %v4002_v4 = vsel %vm1286_vm11, %v3994_v59, -inf  ;;  %v5878_v17 = vld [vmem:[%s7412_s8 + $0x2] ss:$0 sm:$0xff] }
 0x99e   :  { %4006 = vmax.xlane.f32.xlu1 %v4005_v25  ;;  %4003 = vmax.xlane.f32.xlu0 %v4002_v4  ;;  %v3615_v2 = vadd.f32 %v5878_v17, %v3614_v44 }
 0xa1f   :  { %v3998_v8 = vpop.xlane.xlu0 %3997 }
 0xa20   :  { %v4008_v50 = vsub.f32 %v3992_v10, %v3998_v8  ;;  %v5879_v8 = vld [vmem:[%s7412_s8 + $0x3] ss:$0 sm:$0xff] }
 0xa22   :  { %v4012_v51 = vmul.f32 1.442695, %v4008_v50  ;;  %v3685_v50 = vadd.f32 %v5879_v8, %v7097_v22  ;;  %v5880_v22 = vld [vmem:[%s7413_s9 + $0x8] sm:$0xff] }
 0xa23   :  { %v4001_v41 = vpop.xlane.xlu1 %4000 }
 0xa24   :  { %5790 = vpow2.f32 %v4012_v51  ;;  %v4009_v14 = vsub.f32 %v3993_v29, %v4001_v41 }
 0xa26   :  { %v4014_v1 = vmul.f32 1.442695, %v4009_v14 }
 0xa27   :  { %v4007_v15 = vpop.xlane.xlu1 %4006  ;;  %v4004_v16 = vpop.xlane.xlu0 %4003 }
 0xa28   :  { %5792 = vpow2.f32 %v4014_v1  ;;  %v4011_v19 = vsub.f32 %v3995_v48, %v4007_v15  ;;  %v4010_v45 = vsub.f32 %v3994_v59, %v4004_v16  ;;  %v5881_v1 = vld [vmem:[%s7413_s9] sm:$0xff] }
 0xa2a   :  { %v4018_v27 = vmul.f32 1.442695, %v4011_v19  ;;  %v4016_v20 = vmul.f32 1.442695, %v4010_v45  ;;  %v5882_v19 = vld [vmem:[%s7413_s9 + $0x10] sm:$0xff] }
 0xa2c   :  { %5794 = vpow2.f32 %v4018_v27 }
 0xa2d   :  { %5796 = vpow2.f32 %v4016_v20  ;;  %v5883_v20 = vld [vmem:[%s7413_s9 + $0x18] sm:$0xff] }
 0xa31   :  { %v5791_v40 = vpop.eup %5790 }
 0xa32   :  { %v4020_v21 = vsel %vm1286_vm11, %v5791_v40, 0.0 }
 0xa33   :  { %4021 = vadd.xlane.f32.xlu0 %v4020_v21 }
 0xa35   :  { %v5793_v23 = vpop.eup %5792 }
 0xa36   :  { %v4023_v10 = vsel %vm1286_vm11, %v5793_v23, 0.0 }
 0xa37   :  { %4024 = vadd.xlane.f32.xlu1 %v4023_v10 }
 0xa39   :  { %v5795_v55 = vpop.eup %5794 }
 0xa3a   :  { %v5797_v24 = vpop.eup %5796  ;;  %v4029_v12 = vsel %vm1286_vm11, %v5795_v55, 0.0 }
 0xa3b   :  { %4030 = vadd.xlane.f32.xlu1 %v4029_v12  ;;  %v4026_v29 = vsel %vm1286_vm11, %v5797_v24, 0.0 }
 0xa3c   :  { %4027 = vadd.xlane.f32.xlu0 %v4026_v29 }
 0xabc   :  { %v4022_v57 = vpop.xlane.xlu0 %4021 }
 0xabd   :  { %5798 = vrcp.f32 %v4022_v57 }
 0xac0   :  { %v4025_v39 = vpop.xlane.xlu1 %4024 }
 0xac1   :  { %5800 = vrcp.f32 %v4025_v39 }
 0xac4   :  { %v4031_v33 = vpop.xlane.xlu1 %4030 }
 0xac5   :  { %5802 = vrcp.f32 %v4031_v33  ;;  %v4028_v58 = vpop.xlane.xlu0 %4027 }
 0xac6   :  { %5804 = vrcp.f32 %v4028_v58 }
 0xaca   :  { %v5799_v59 = vpop.eup %5798 }
 0xacb   :  { %v4036_v48 = vmul.f32 %v5799_v59, %v5791_v40 }
 0xacd   :  { %5694 = vmatmul.mubr.msk.f32.vlgmr.msra.gmra.mxu0 %vm1286_vm11, %v4036_v48 }
 0xace   :  { %v5801_v25 = vpop.eup %5800  ;;  %5702 = vmatpush3.msra.mxu0 %v3615_v2  ;;  %5703 = vmatprep.mubr.msk.f32.mxu0 %vm5910_vm10, %v5909_v61 }
 0xacf   :  { %v4037_v4 = vmul.f32 %v5801_v25, %v5793_v23  ;;  %5711 = vmatprep.subr.mxu0 %v5909_v61 }
 0xad1   :  { %5699 = vmatmul.mubr.msk.f32.vlgmr.msra.gmra.mxu1 %vm1286_vm11, %v4037_v4 }
 0xad2   :  { %v5803_v51 = vpop.eup %5802  ;;  %5707 = vmatpush3.msra.mxu1 %v3685_v50  ;;  %5708 = vmatprep.mubr.msk.f32.mxu1 %vm5910_vm10, %v5909_v61 }
 0xad3   :  { %v5805_v44 = vpop.eup %5804  ;;  %v4039_v41 = vmul.f32 %v5803_v51, %v5795_v55  ;;  %5716 = vmatprep.subr.mxu1 %v5909_v61 }
 0xad4   :  { %v4038_v14 = vmul.f32 %v5805_v44, %v5797_v24 }
 0xad5   :  { %5709 = vmatmul.mubr.msk.f32.vlgmr.msra.gmra.mxu1 %vm1286_vm11, %v4039_v41 }
 0xad6   :  { %5704 = vmatmul.mubr.msk.f32.vlgmr.msra.gmra.mxu0 %vm1286_vm11, %v4038_v14  ;;  %5717 = vmatpush3.msra.mxu1 %v5880_v22 }
 0xad7   :  { %5712 = vmatpush3.msra.mxu0 %v5881_v1  ;;  %5713 = vmatprep.mubr.msk.f32.mxu0 %vm5910_vm10, %v5909_v61 }
 0xad8   :  { %5718 = vmatprep.mubr.msk.f32.mxu1 %vm5910_vm10, %v5909_v61  ;;  %5721 = vmatprep.subr.mxu0 %v5909_v61 }
 0xad9   :  { %5726 = vmatprep.subr.mxu1 %v5909_v61 }
 0xb8d   :  { %v4109_v15 = vpop.f32.mrf.mxu0 }
 0xb8e   :  { %5714 = vmatmul.mubr.msk.f32.vlgmr.msra.gmra.mxu0 %vm1286_vm11, %v4109_v15 }
 0xb8f   :  { %v5695_v16 = vpop.f32.mrf.mxu0  ;;  %5722 = vmatpush3.msra.mxu0 %v5882_v19  ;;  %5723 = vmatprep.mubr.msk.f32.mxu0 %vm5910_vm10, %v5909_v61 }
 0xb90   :  { %5731 = vmatprep.subr.mxu0 %v5909_v61 }
 0xb91   :  { %v4182_v45 = vpop.f32.mrf.mxu1 }
 0xb92   :  { %5719 = vmatmul.mubr.msk.f32.vlgmr.msra.gmra.mxu1 %vm1286_vm11, %v4182_v45 }
 0xb93   :  { %v5700_v27 = vpop.f32.mrf.mxu1  ;;  %5727 = vmatpush3.msra.mxu1 %v5883_v20  ;;  %5728 = vmatprep.mubr.msk.f32.mxu1 %vm5910_vm10, %v5909_v61 }
 0xb94   :  { %5742 = vmatprep.subr.mxu1 %v5909_v61 }
 0xb95   :  { %v4328_v40 = vpop.f32.mrf.mxu1 }
 0xb96   :  { %v4255_v21 = vpop.f32.mrf.mxu0  ;;  %5729 = vmatmul.mubr.msk.f32.vlgmr.msra.gmra.mxu1 %vm1286_vm11, %v4328_v40 }
 0xb97   :  { %5724 = vmatmul.mubr.msk.f32.vlgmr.msra.gmra.mxu0 %vm1286_vm11, %v4255_v21  ;;  %v5710_v23 = vpop.f32.mrf.mxu1  ;;  %5743 = vmatpush3.msra.mxu1 %v6936_v62 }
 0xb98   :  { %v5705_v10 = vpop.f32.mrf.mxu0  ;;  %5732 = vmatpush3.msra.mxu0 %v6703_v34  ;;  %5739 = vmatprep.mubr.msk.f32.mxu0 %vm5910_vm10, %v5909_v61 }
 0xb99   :  { %5733 = vmatprep.subr.mxu0 %v5909_v61  ;;  %5744 = vmatprep.subr.mxu1 %v5909_v61 }
 0xb9a   :  { %5734 = vmatpush3.msra.mxu0 %v6708_v49  ;;  %5745 = vmatpush3.msra.mxu1 %v6943_v9 }
 0xb9b   :  { %5735 = vmatprep.subr.mxu0 %v5909_v61  ;;  %5746 = vmatprep.subr.mxu1 %v5909_v61 }
 0xb9c   :  { %5736 = vmatpush3.msra.mxu0 %v6715_v63  ;;  %5747 = vmatpush3.msra.mxu1 %v6950_v42 }
 0xb9d   :  { %5737 = vmatprep.subr.mxu0 %v5909_v61  ;;  %5748 = vmatprep.subr.mxu1 %v5909_v61 }
 0xb9e   :  { %5738 = vmatpush3.msra.mxu0 %v6722_v0  ;;  %5749 = vmatpush3.msra.mxu1 %v6957_v56 }
 0xb9f   :  { %5750 = vmatprep.subr.mxu1 %v5909_v61  ;;  %5758 = vmatprep.mubr.msk.f32.mxu1 %vm5910_vm10, %v5909_v61 }
 0xba0   :  { %5751 = vmatpush3.msra.mxu1 %v6964_v60 }
 0xba1   :  { %5752 = vmatprep.subr.mxu1 %v5909_v61 }
 0xba2   :  { %5753 = vmatpush3.msra.mxu1 %v6971_v5 }
 0xba3   :  { %5754 = vmatprep.subr.mxu1 %v5909_v61 }
 0xba4   :  { %5755 = vmatpush3.msra.mxu1 %v6977_v6 }
 0xba5   :  { %5756 = vmatprep.subr.mxu1 %v5909_v61 }
 0xba6   :  { %5757 = vmatpush3.msra.mxu1 %v6983_v11  ;;  %v5884_v11 = vld [vmem:[%s7414_s10] ss:$0 sm:$0xff] }
 0xc4e   :  { %v4401_v34 = vpop.f32.mrf.mxu0 }
 0xc4f   :  { %v4624_v9 = vsel %vm231_vm9, %v4401_v34, 0.0 }
 0xc50   :  { %v5715_v49 = vpop.f32.mrf.mxu0 }
 0xc52   :  { %v4474_v63 = vpop.f32.mrf.mxu1 }
 0xc53   :  { %v4625_v0 = vsel %vm231_vm9, %v4474_v63, 0.0 }
 0xc54   :  { %v5720_v62 = vpop.f32.mrf.mxu1  ;;  %v4626_v56 = vadd.f32 %v4625_v0, %v4624_v9 }
 0xc56   :  { %v4620_v42 = vpop.f32.mrf.mxu1 }
 0xc57   :  { %v4547_v60 = vpop.f32.mrf.mxu0  ;;  %v4629_v61 = vsel %vm231_vm9, %v4620_v42, 0.0 }
 0xc58   :  { %v4627_v5 = vsel %vm231_vm9, %v4547_v60, 0.0  ;;  %v5730_v55 = vpop.f32.mrf.mxu1 }
 0xc59   :  { %v4628_v24 = vadd.f32 %v4627_v5, %v4626_v56  ;;  %v5725_v6 = vpop.f32.mrf.mxu0 }
 0xc5b   :  { %v4630_v12 = vadd.f32 %v4629_v61, %v4628_v24 }
 0xc5d   :  { %v4631_v29 = vadd.f32 %v5884_v11, %v4630_v12 }
 0xc5f   :  { %v4633_v57 = vrot.slane %v4631_v29, 1  ;;  %v4634_v39 = vrot.slane %v4631_v29, 2  ;;  %v4635_v33 = vrot.slane %v4631_v29, 3  ;;  %v4636_v58 = vrot.slane %v4631_v29, 4 }
 0xc60   :  { %v4637_v59 = vrot.slane %v4631_v29, 5  ;;  %v4638_v48 = vrot.slane %v4631_v29, 6  ;;  %v4639_v17 = vrot.slane %v4631_v29, 7  ;;  %v4648_v50 = vadd.f32 %v4631_v29, %v6558_v52 }
 0xc61   :  { %v4649_v2 = vadd.f32 %v4633_v57, %v6560_v53  ;;  %v4650_v25 = vadd.f32 %v4634_v39, %v6563_v3  ;;  %v4651_v4 = vadd.f32 %v4635_v33, %v6573_v18  ;;  %v4652_v8 = vadd.f32 %v4636_v58, %v6577_v26 }
 0xc62   :  { %v4653_v51 = vadd.f32 %v4637_v59, %v6581_v43  ;;  %v4654_v14 = vadd.f32 %v4638_v48, %v6592_v35  ;;  %v4655_v22 = vadd.f32 %v4639_v17, %v6600_v54 }
 0xc63   :  { %v4664_v44 = vrot.slane %v4649_v2, 7  ;;  %v4666_v41 = vrot.slane %v4650_v25, 6  ;;  %v4668_v15 = vrot.slane %v4651_v4, 5  ;;  %v4670_v3 = vrot.slane %v4652_v8, 4 }
 0xc64   :  { %v4672_v16 = vrot.slane %v4653_v51, 3  ;;  %v4674_v52 = vrot.slane %v4654_v14, 2  ;;  %v4676_v19 = vrot.slane %v4655_v22, 1 }
 0xc65   :  { %v4665_v1 = vsel %vm216_vm2, %v4664_v44, %v4648_v50 }
 0xc66   :  { %v4667_v53 = vsel %vm218_vm3, %v4666_v41, %v4665_v1 }
 0xc67   :  { %v4669_v18 = vsel %vm220_vm4, %v4668_v15, %v4667_v53 }
 0xc68   :  { %v4671_v26 = vsel %vm222_vm5, %v4670_v3, %v4669_v18 }
 0xc69   :  { %v4673_v43 = vsel %vm224_vm6, %v4672_v16, %v4671_v26 }
 0xc6a   :  { %v4675_v45 = vsel %vm226_vm7, %v4674_v52, %v4673_v43 }
 0xc6b   :  { %v4677_v35 = vsel %vm228_vm8, %v4676_v19, %v4675_v45 }
 0xc6c   :  { %v4679_v54 = vsel %vm231_vm9, %v4677_v35, 0.0 }
 0xc6d   :  { %4680 = vadd.xlane.f32.xlu0 %v4679_v54 }
 0xcf6   :  { %v4681_v27 = vpop.xlane.xlu0 %4680 }
 0xcf7   :  { %v4682_v20 = vmul.f32 0.03125, %v4681_v27 }
 0xcf9   :  { %v4684_v40 = vrot.slane %v4682_v20, 1  ;;  %v4685_v21 = vrot.slane %v4682_v20, 2  ;;  %v4686_v23 = vrot.slane %v4682_v20, 3  ;;  %v4687_v10 = vrot.slane %v4682_v20, 4 }
 0xcfa   :  { %v4688_v34 = vrot.slane %v4682_v20, 5  ;;  %v4689_v49 = vrot.slane %v4682_v20, 6  ;;  %v4690_v63 = vrot.slane %v4682_v20, 7  ;;  %v4699_v0 = vsub.f32 %v4648_v50, %v4682_v20 }
 0xcfb   :  { %v4700_v62 = vsub.f32 %v4649_v2, %v4684_v40  ;;  %v4701_v9 = vsub.f32 %v4650_v25, %v4685_v21  ;;  %v4702_v42 = vsub.f32 %v4651_v4, %v4686_v23  ;;  %v4703_v56 = vsub.f32 %v4652_v8, %v4687_v10 }
 0xcfc   :  { %v4704_v60 = vsub.f32 %v4653_v51, %v4688_v34  ;;  %v4705_v5 = vsub.f32 %v4654_v14, %v4689_v49  ;;  %v4706_v55 = vsub.f32 %v4655_v22, %v4690_v63  ;;  %v4707_v11 = vmul.f32 %v4699_v0, %v4699_v0  ;;  %v5885_v34 = vld [vmem:[%s7405_s1] ss:$0 sm:$0xff] }
 0xcfd   :  { %v4708_v24 = vmul.f32 %v4700_v62, %v4700_v62  ;;  %v4709_v6 = vmul.f32 %v4701_v9, %v4701_v9  ;;  %v4710_v61 = vmul.f32 %v4702_v42, %v4702_v42  ;;  %v4711_v12 = vmul.f32 %v4703_v56, %v4703_v56 }
 0xcfe   :  { %v4712_v29 = vmul.f32 %v4704_v60, %v4704_v60  ;;  %v4713_v33 = vmul.f32 %v4705_v5, %v4705_v5  ;;  %v4714_v58 = vmul.f32 %v4706_v55, %v4706_v55 }
 0xcff   :  { %v4723_v57 = vrot.slane %v4708_v24, 7  ;;  %v4725_v39 = vrot.slane %v4709_v6, 6  ;;  %v4727_v48 = vrot.slane %v4710_v61, 5  ;;  %v4729_v2 = vrot.slane %v4711_v12, 4 }
 0xd00   :  { %v4731_v4 = vrot.slane %v4712_v29, 3  ;;  %v4733_v50 = vrot.slane %v4713_v33, 2  ;;  %v4735_v44 = vrot.slane %v4714_v58, 1 }
 0xd01   :  { %v4724_v59 = vsel %vm216_vm2, %v4723_v57, %v4707_v11 }
 0xd02   :  { %v4726_v17 = vsel %vm218_vm3, %v4725_v39, %v4724_v59 }
 0xd03   :  { %v4728_v25 = vsel %vm220_vm4, %v4727_v48, %v4726_v17 }
 0xd04   :  { %v4730_v8 = vsel %vm222_vm5, %v4729_v2, %v4728_v25 }
 0xd05   :  { %v4732_v51 = vsel %vm224_vm6, %v4731_v4, %v4730_v8 }
 0xd06   :  { %v4734_v41 = vsel %vm226_vm7, %v4733_v50, %v4732_v51 }
 0xd07   :  { %v4736_v14 = vsel %vm228_vm8, %v4735_v44, %v4734_v41 }
 0xd08   :  { %v4738_v22 = vsel %vm231_vm9, %v4736_v14, 0.0 }
 0xd09   :  { %4739 = vadd.xlane.f32.xlu1 %v4738_v22 }
 0xd92   :  { %v4740_v1 = vpop.xlane.xlu1 %4739 }
 0xd93   :  { %v4741_v15 = vmul.f32 0.03125, %v4740_v1 }
 0xd95   :  { %v4742_v53 = vadd.f32 1e-05, %v4741_v15 }
 0xd97   :  { %5806 = vrsqrt.f32 %v4742_v53 }
 0xda4   :  { %v5807_v3 = vpop.eup %5806 }
 0xda5   :  { %v4745_v18 = vrot.slane %v5807_v3, 1  ;;  %v4746_v16 = vrot.slane %v5807_v3, 2  ;;  %v4747_v26 = vrot.slane %v5807_v3, 3  ;;  %v4748_v52 = vrot.slane %v5807_v3, 4 }
 0xda6   :  { %v4749_v43 = vrot.slane %v5807_v3, 5  ;;  %v4750_v19 = vrot.slane %v5807_v3, 6  ;;  %v4751_v45 = vrot.slane %v5807_v3, 7  ;;  %v4760_v35 = vmul.f32 %v5807_v3, %v4699_v0  ;;  %v5886_v0 = vld [vmem:[%s7406_s2] ss:$0 sm:$0xff] }
 0xda7   :  { %v4761_v54 = vmul.f32 %v4745_v18, %v4700_v62  ;;  %v4762_v27 = vmul.f32 %v4746_v16, %v4701_v9  ;;  %v4763_v20 = vmul.f32 %v4747_v26, %v4702_v42  ;;  %v4764_v40 = vmul.f32 %v4748_v52, %v4703_v56  ;;  %v5089_v26 = vld [vmem:[%s7418_s14] ss:$0 sm:$0xff]  ;;  %s5911_s14 = smov [#allocation2]  }
 0xda8   :  { %v4765_v21 = vmul.f32 %v4749_v43, %v4704_v60  ;;  %v4766_v23 = vmul.f32 %v4750_v19, %v4705_v5  ;;  %v4767_v10 = vmul.f32 %v4751_v45, %v4706_v55  ;;  %v4768_v49 = vmul.f32 %v5885_v34, %v4760_v35  ;;  %s5033_s25 = sshll.u32 %s5911_s14, 4  ;;  %s5034_s25 = int_to_ptr.vmem [resolvable:$true] %s5033_s25 }
 0xda9   :  { %v4769_v63 = vmul.f32 %v5885_v34, %v4761_v54  ;;  %v4770_v24 = vmul.f32 %v5885_v34, %v4762_v27  ;;  %v4771_v6 = vmul.f32 %v5885_v34, %v4763_v20  ;;  %v4772_v61 = vmul.f32 %v5885_v34, %v4764_v40  ;;  %s5887_s11 = scalar_lea.vmem %s5034_s25, 256  ;;  %p5892_p1 = scmp.lt.s32.totalorder %s5034_s25, %s5034_s25 }
 0xdaa   :  { %v4773_v12 = vmul.f32 %v5885_v34, %v4765_v21  ;;  %v4774_v11 = vmul.f32 %v5885_v34, %v4766_v23  ;;  %v4775_v29 = vmul.f32 %v5885_v34, %v4767_v10  ;;  %v7296_v60 = vadd.f32 %v5886_v0, %v4768_v49  ;;  %p5888_p0 = scmp.ne.s32.totalorder %s5034_s25, %s5887_s11  ;;  %p5893_p2 = scmp.lt.s32.totalorder %s5887_s11, %s5887_s11 }
 0xdab   :  { %v7288_v62 = vadd.f32 %v5886_v0, %v4769_v63  ;;  %v7290_v9 = vadd.f32 %v5886_v0, %v4770_v24  ;;  %v7292_v42 = vadd.f32 %v5886_v0, %v4771_v6  ;;  %v7294_v56 = vadd.f32 %v5886_v0, %v4772_v61 }
 0xdac   :  { %v7298_v5 = vadd.f32 %v5886_v0, %v4773_v12  ;;  %v7302_v39 = vadd.f32 %v5886_v0, %v4774_v11  ;;  %v7304_v33 = vadd.f32 %v5886_v0, %v4775_v29  ;;  %v2571_v52 = vadd.f32 %v5089_v26, %v7112_v28  ;;  %p5894_p3 = por %p5893_p2, %p5892_p1 }
 0xdad   :  { %v4792_v55 = vrot.slane %v7288_v62, 7  ;;  %v4794_v57 = vrot.slane %v7290_v9, 6  ;;  %v4796_v59 = vrot.slane %v7292_v42, 5  ;;  %v4798_v17 = vrot.slane %v7294_v56, 4 }
 0xdae   :  { %v4800_v25 = vrot.slane %v7298_v5, 3  ;;  %v4802_v8 = vrot.slane %v7302_v39, 2  ;;  %v4804_v51 = vrot.slane %v7304_v33, 1  ;;  %v2575_v43 = vrot.slane %v2571_v52, 1  ;;  %p5895_p4 = pnand %p5894_p3, %p5888_p0 }
 0xdaf   :  { %v4793_v58 = vsel %vm216_vm2, %v4792_v55, %v7296_v60  ;;  %v2576_v19 = vrot.slane %v2571_v52, 2  ;;  %v2577_v45 = vrot.slane %v2571_v52, 3  ;;  %v2578_v35 = vrot.slane %v2571_v52, 4 }
 0xdb0   :  { %v4795_v48 = vsel %vm218_vm3, %v4794_v57, %v4793_v58  ;;  %v2580_v54 = vrot.slane %v2571_v52, 6  ;;  %v2581_v27 = vrot.slane %v2571_v52, 7  ;;  %v7327_v20 = vsub.s32 0, %v6012_v7 }
 0xdb1   :  { %v4797_v2 = vsel %vm220_vm4, %v4796_v59, %v4795_v48  ;;  %v2590_v40 = vadd.f32 %v2571_v52, %v6750_v31  ;;  %v2591_v21 = vadd.f32 %v2575_v43, %v6742_v36  ;;  %v2592_v23 = vadd.f32 %v2576_v19, %v6744_v37 }
 0xdb2   :  { %v4799_v4 = vsel %vm222_vm5, %v4798_v17, %v4797_v2  ;;  %v2593_v10 = vadd.f32 %v2577_v45, %v6746_v38  ;;  %v2594_v28 = vadd.f32 %v2578_v35, %v6748_v30  ;;  %v2596_v49 = vadd.f32 %v2580_v54, %v6754_v32 }
 0xdb3   :  { %v4801_v50 = vsel %vm224_vm6, %v4800_v25, %v4799_v4  ;;  %v2597_v63 = vadd.f32 %v2581_v27, %v6756_v47  ;;  %v2601_v24 = vrot.slane %v2590_v40, %v7327_v20  ;;  %v2605_v6 = vrot.slane %v2591_v21, %v7327_v20 }
 0xdb4   :  { %v4803_v44 = vsel %vm226_vm7, %v4802_v8, %v4801_v50  ;;  %v2609_v31 = vrot.slane %v2592_v23, %v7327_v20  ;;  %v2613_v36 = vrot.slane %v2593_v10, %v7327_v20  ;;  %v2617_v37 = vrot.slane %v2594_v28, %v7327_v20 }
 0xdb5   :  { %v4805_v41 = vsel %vm228_vm8, %v4804_v51, %v4803_v44  ;;  %v2625_v30 = vrot.slane %v2596_v49, %v7327_v20  ;;  %v2630_v32 = vsel %vm142_vm0, %v2601_v24, 0.0  ;;  %v2631_v61 = vsel %vm142_vm0, %v2605_v6, 0.0 }
 0xdb6   :  { %5740 = vmatmul.mubr.msk.f32.vlgmr.msra.gmra.mxu0 %vm231_vm9, %v4805_v41  ;;  %v2632_v12 = vsel %vm142_vm0, %v2609_v31, 0.0  ;;  %v2633_v11 = vsel %vm142_vm0, %v2613_v36, 0.0  ;;  %v2634_v0 = vsel %vm142_vm0, %v2617_v37, 0.0 }
 0xdb7   :  { %v2636_v57 = vsel %vm142_vm0, %v2625_v30, 0.0 }
 0xe76   :  { %v4874_v14 = vpop.f32.mrf.mxu0 }
 0xe77   :  { %v4875_v22 = vadd.f32 %v6992_v13, %v4874_v14  ;;  %v2579_v13 = vrot.slane %v2571_v52, 5 }
 0xe78   :  { %v5741_v1 = vpop.f32.mrf.mxu0 }
 0xe79   :  { %v4879_v15 = vmul.f32 0.70710677, %v4875_v22  ;;  %v4878_v3 = vmul.f32 0.5, %v4875_v22  ;;  %v2595_v34 = vadd.f32 %v2579_v13, %v6752_v46  ;;  %v2629_v46 = vrot.slane %v2597_v63, %v7327_v20 }
 0xe7b   :  { %5808 = verf.f32 %v4879_v15  ;;  %v2621_v38 = vrot.slane %v2595_v34, %v7327_v20  ;;  %v2637_v58 = vsel %vm142_vm0, %v2629_v46, 0.0 }
 0xe7d   :  { %v2635_v55 = vsel %vm142_vm0, %v2621_v38, 0.0 }
 0xe88   :  { %v5809_v53 = vpop.eup %5808 }
 0xe89   :  { %v4881_v18 = vadd.f32 1.0, %v5809_v53 }
 0xe8b   :  { %v4882_v16 = vmul.f32 %v4881_v18, %v4878_v3 }
 0xe8d   :  { %5759 = vmatmul.mubr.msk.f32.vlgmr.msra.gmra.mxu1 %vm2500_vm13, %v4882_v16 }
 0xf4d   :  { %v4952_v47 = vpop.f32.mrf.mxu1 }
 0xf4e   :  { %v4953_v29 = vadd.f32 %v5089_v26, %v4952_v47 }
 0xf4f   :  { %v5760_v59 = vpop.f32.mrf.mxu1 }
 0xf50   :  { %v4957_v48 = vrot.slane %v4953_v29, 1  ;;  %v4958_v17 = vrot.slane %v4953_v29, 2  ;;  %v4959_v2 = vrot.slane %v4953_v29, 3  ;;  %v4960_v25 = vrot.slane %v4953_v29, 4 }
 0xf51   :  { %v4961_v4 = vrot.slane %v4953_v29, 5  ;;  %v4962_v8 = vrot.slane %v4953_v29, 6  ;;  %v4963_v50 = vrot.slane %v4953_v29, 7  ;;  %v4972_v51 = vadd.f32 %v4953_v29, %v7296_v60 }
 0xf52   :  { %v4973_v44 = vadd.f32 %v4957_v48, %v7288_v62  ;;  %v4974_v41 = vadd.f32 %v4958_v17, %v7290_v9  ;;  %v4975_v14 = vadd.f32 %v4959_v2, %v7292_v42  ;;  %v4976_v22 = vadd.f32 %v4960_v25, %v7294_v56 }
 0xf53   :  { %v4977_v1 = vadd.f32 %v4961_v4, %v7298_v5  ;;  %v4978_v15 = vadd.f32 %v4962_v8, %v7302_v39  ;;  %v4979_v53 = vadd.f32 %v4963_v50, %v7304_v33  ;;  %v4983_v3 = vrot.slane %v4972_v51, %v7327_v20 }
 0xf54   :  { %v4987_v60 = vrot.slane %v4973_v44, %v7327_v20  ;;  %v4991_v62 = vrot.slane %v4974_v41, %v7327_v20  ;;  %v4995_v9 = vrot.slane %v4975_v14, %v7327_v20  ;;  %v4999_v42 = vrot.slane %v4976_v22, %v7327_v20 }
 0xf55   :  { %v5003_v56 = vrot.slane %v4977_v1, %v7327_v20  ;;  %v5007_v5 = vrot.slane %v4978_v15, %v7327_v20  ;;  %v5011_v39 = vrot.slane %v4979_v53, %v7327_v20  ;;  %v5012_v33 = vsel %vm2638_vm12, %v4983_v3, %v2630_v32 }
 0xf56   :  { %v5013_v18 = vsel %vm2638_vm12, %v4987_v60, %v2631_v61  ;;  %v5014_v16 = vsel %vm2638_vm12, %v4991_v62, %v2632_v12  ;;  %v5015_v26 = vsel %vm2638_vm12, %v4995_v9, %v2633_v11  ;;  %v5016_v52 = vsel %vm2638_vm12, %v4999_v42, %v2634_v0  ;;  %5020 = vst.msk [vmem:[#allocation2] sm:$0x3] %vm151_vm1, %v5012_v33 }
 0xf57   :  { %v5017_v43 = vsel %vm2638_vm12, %v5003_v56, %v2635_v55  ;;  %v5018_v19 = vsel %vm2638_vm12, %v5007_v5, %v2636_v57  ;;  %v5019_v45 = vsel %vm2638_vm12, %v5011_v39, %v2637_v58  ;;  %5021 = vst.msk [vmem:[#allocation2 + $0x2] sm:$0x3] %vm151_vm1, %v5013_v18  ;;  %5022 = vst.msk [vmem:[#allocation2 + $0x4] sm:$0x3] %vm151_vm1, %v5014_v16 }
 0xf58   :  { %5023 = vst.msk [vmem:[#allocation2 + $0x6] sm:$0x3] %vm151_vm1, %v5015_v26  ;;  %5024 = vst.msk [vmem:[#allocation2 + $0x8] sm:$0x3] %vm151_vm1, %v5016_v52 }
 0xf59   :  { %5025 = vst.msk [vmem:[#allocation2 + $0xa] sm:$0x3] %vm151_vm1, %v5017_v43  ;;  %5026 = vst.msk [vmem:[#allocation2 + $0xc] sm:$0x3] %vm151_vm1, %v5018_v19 }
 0xf5a   :  { %5027 = vst.msk [vmem:[#allocation2 + $0xe] sm:$0x3] %vm151_vm1, %v5019_v45 }
 0xf5b   :  { %5898 = shalt.err (!%p5895_p4)
}
 0xf5c   :  { %s5912_s26 = smov 32   ;;  %s5913_s27 = smov 2  }
 0xf5d   :  { %5039 = dma.vmem_to_hbm [thread:$0]  %s5034_s25, 256, %s7419_s15, [#allocation3], %s5912_s26, %s5912_s26, %s5913_s27  }
 0xf5e   :  { %5907 = dma.done.wait [#allocation3], 256  }
 0xf5f   :  { %5908 = vsyncadd [#allocation3], 4294967040 }
 0xf60   :  { %5043 = vsyncpa [#allocation3], 1 }

</bundles_post_ra>
